<compile_context>
chip_gen: v7x
topology: tpu7x:2x2x1
jax: 0.10.0
libtpu: 0.0.40
codegen_flags: <defaults>
</compile_context>

<pallas_src>
import functools

import jax
import jax.numpy as jnp
from jax.experimental import pallas as pl
from jax.experimental.pallas import tpu as pltpu

LANE = 128  # padded per-gate hidden width and padded linear-output width


def gru_encoder_kernel(x_ref, h0_ref, wih_ref, whh_ref, bg_ref, bhn_ref,
                       wlin_ref, blin_ref, out_ref, *,
                       batch, seq_len, in_size, hp):
    B, T, I, Hp = batch, seq_len, in_size, hp

    # ---- hoisted input projection: single (B*T, I) x (I, 3*Hp) matmul -------
    # bg_ref holds b_ih with b_hh already folded in for the r and z gates.
    x_flat = x_ref[...].reshape(B * T, I)
    gi = jnp.dot(x_flat, wih_ref[...],
                 preferred_element_type=jnp.float32) + bg_ref[...]
    gi = gi.reshape(B, T, 3 * Hp)

    whh = whh_ref[...]          # (Hp, 3*Hp), padded rows/cols are zero
    b_hn = bhn_ref[...]         # (1, Hp)

    # ---- serial GRU recurrence, fully unrolled (T small & static) -----------
    # Padded hidden lanes stay exactly zero across steps (zero-padded weights,
    # biases and h0), so no masking is needed anywhere.
    h = h0_ref[...]                                         # (B, Hp)
    for t in range(T):
        gi_t = gi[:, t, :]                                  # (B, 3*Hp) static
        gh = jnp.dot(h, whh, preferred_element_type=jnp.float32)  # (B, 3*Hp)

        # lane-aligned 128-wide gate blocks: [r | z | n]
        r = jax.nn.sigmoid(gi_t[:, 0:Hp] + gh[:, 0:Hp])
        z = jax.nn.sigmoid(gi_t[:, Hp:2 * Hp] + gh[:, Hp:2 * Hp])
        n = jnp.tanh(gi_t[:, 2 * Hp:] + r * (gh[:, 2 * Hp:] + b_hn))
        h = (1.0 - z) * n + z * h

    # ---- fused Linear(H -> 3, padded to 128 lanes) + Sigmoid -----------------
    y = jnp.dot(h, wlin_ref[...],
                preferred_element_type=jnp.float32) + blin_ref[...]
    out_ref[...] = jax.nn.sigmoid(y)                        # (B, 128) dense vst


def encoder_event_forward(x_btI, h0_1bh, params):
    """x_btI: (B, T, I) float32 (batch_first). h0_1bh: (1, B, H).
       Returns features: (1, B, 3) like the PyTorch GRU branch."""
    B, T, I = x_btI.shape
    H = h0_1bh.shape[-1]
    Hp = LANE          # padded per-gate hidden width
    OUTP = LANE        # padded linear output width
    assert H <= Hp

    # hidden state padded to (B, Hp) with zeros in lanes H..Hp-1
    h0 = jnp.zeros((B, Hp), jnp.float32).at[:, :H].set(h0_1bh[0])

    # Per-gate padded transposed weights; PyTorch gate layout is [r; z; n].
    def pad_gates_T(w, rows, rows_pad):
        out = jnp.zeros((rows_pad, 3 * Hp), jnp.float32)
        for g in range(3):
            out = out.at[:rows, g * Hp:g * Hp + H].set(w[g * H:(g + 1) * H, :].T)
        return out

    wih_pad = pad_gates_T(params["w_ih"], I, I)       # (I,  3*Hp)
    whh_pad = pad_gates_T(params["w_hh"], H, Hp)      # (Hp, 3*Hp)

    b_ih, b_hh = params["b_ih"], params["b_hh"]
    bg = jnp.zeros((1, 3 * Hp), jnp.float32)
    bg = bg.at[0, 0 * Hp:0 * Hp + H].set(b_ih[0:H] + b_hh[0:H])            # r
    bg = bg.at[0, 1 * Hp:1 * Hp + H].set(b_ih[H:2 * H] + b_hh[H:2 * H])    # z
    bg = bg.at[0, 2 * Hp:2 * Hp + H].set(b_ih[2 * H:3 * H])                # n (input side)
    b_hn = jnp.zeros((1, Hp), jnp.float32).at[0, :H].set(b_hh[2 * H:3 * H])

    wlin_pad = jnp.zeros((Hp, OUTP), jnp.float32).at[:H, :3].set(params["w_lin"].T)
    blin_pad = jnp.zeros((1, OUTP), jnp.float32).at[0, :3].set(params["b_lin"])

    kernel = functools.partial(gru_encoder_kernel, batch=B, seq_len=T,
                               in_size=I, hp=Hp)

    out = pl.pallas_call(
        kernel,
        out_shape=jax.ShapeDtypeStruct((B, OUTP), jnp.float32),
        grid_spec=pltpu.PrefetchScalarGridSpec(
            num_scalar_prefetch=0,
            grid=(1,),                                      # single invocation
            in_specs=[
                pl.BlockSpec((B, T, I), lambda i: (0, 0, 0)),     # x (batch_first)
                pl.BlockSpec((B, Hp), lambda i: (0, 0)),          # h0 (padded)
                pl.BlockSpec((I, 3 * Hp), lambda i: (0, 0)),      # W_ih^T (padded)
                pl.BlockSpec((Hp, 3 * Hp), lambda i: (0, 0)),     # W_hh^T (padded)
                pl.BlockSpec((1, 3 * Hp), lambda i: (0, 0)),      # folded gate bias
                pl.BlockSpec((1, Hp), lambda i: (0, 0)),          # b_hn
                pl.BlockSpec((Hp, OUTP), lambda i: (0, 0)),       # W_lin^T (padded)
                pl.BlockSpec((1, OUTP), lambda i: (0, 0)),        # b_lin (padded)
            ],
            out_specs=pl.BlockSpec((B, OUTP), lambda i: (0, 0)),
        ),
        compiler_params=pltpu.CompilerParams(
            dimension_semantics=("arbitrary",)),
    )(x_btI, h0, wih_pad, whh_pad, bg, b_hn, wlin_pad, blin_pad)

    return out[:, :3][None, :, :]                     # (1, B, 3)


def reference_forward(x_btI, h0_1bh, params):
    """Pure-JAX reference of the same computation (correctness check)."""
    H = h0_1bh.shape[-1]
    h = h0_1bh[0]

    def step(h, x_t):
        gi = x_t @ params["w_ih"].T + params["b_ih"]
        gh = h @ params["w_hh"].T + params["b_hh"]
        i_r, i_z, i_n = gi[:, :H], gi[:, H:2 * H], gi[:, 2 * H:]
        h_r, h_z, h_n = gh[:, :H], gh[:, H:2 * H], gh[:, 2 * H:]
        r = jax.nn.sigmoid(i_r + h_r)
        z = jax.nn.sigmoid(i_z + h_z)
        n = jnp.tanh(i_n + r * h_n)
        return (1.0 - z) * n + z * h, None

    h, _ = jax.lax.scan(step, h, jnp.transpose(x_btI, (1, 0, 2)))
    y = jax.nn.sigmoid(h @ params["w_lin"].T + params["b_lin"])
    return y[None]


def init_params(key, input_size, hidden_size):
    """Deterministic PyTorch-style init: U(-1/sqrt(H), 1/sqrt(H))."""
    ks = jax.random.split(key, 6)
    bound = 1.0 / jnp.sqrt(jnp.float32(hidden_size))
    u = lambda k, shape: jax.random.uniform(k, shape, jnp.float32, -bound, bound)
    return {
        "w_ih": u(ks[0], (3 * hidden_size, input_size)),
        "w_hh": u(ks[1], (3 * hidden_size, hidden_size)),
        "b_ih": u(ks[2], (3 * hidden_size,)),
        "b_hh": u(ks[3], (3 * hidden_size,)),
        "w_lin": u(ks[4], (3, hidden_size)),
        "b_lin": u(ks[5], (3,)),
    }


if __name__ == "__main__":
    # TODO(synk): checkpoint load (torch.load of trained_models/*.pth) replaced
    # by deterministic in-script initialization.
    B, T, I, H = 2, 8, 4, 32
    key = jax.random.PRNGKey(0)
    k_x, k_h, k_p = jax.random.split(key, 3)

    x = jax.random.normal(k_x, (B, T, I), jnp.float32)          # batch_first
    h0 = jax.random.normal(k_h, (1, B, H), jnp.float32)
    params = init_params(k_p, I, H)

    out = jax.block_until_ready(encoder_event_forward(x, h0, params))
    ref = jax.block_until_ready(reference_forward(x, h0, params))

    assert out.shape == (1, B, 3)
    assert jnp.allclose(out, ref, atol=1e-5, rtol=1e-5), (out, ref)

    print("KERNEL_OK")
</pallas_src>

<mosaic_0001>
module attributes {stable_mosaic.version = 11 : i64} {
  func.func @gru_encoder_kernel(%arg0: i32, %arg1: memref<2x8x4xf32, #tpu.memory_space<vmem>>, %arg2: memref<2x128xf32, #tpu.memory_space<vmem>>, %arg3: memref<4x384xf32, #tpu.memory_space<vmem>>, %arg4: memref<128x384xf32, #tpu.memory_space<vmem>>, %arg5: memref<1x384xf32, #tpu.memory_space<vmem>>, %arg6: memref<1x128xf32, #tpu.memory_space<vmem>>, %arg7: memref<128x128xf32, #tpu.memory_space<vmem>>, %arg8: memref<1x128xf32, #tpu.memory_space<vmem>>, %arg9: memref<2x128xf32, #tpu.memory_space<vmem>>) attributes {dimension_semantics = [#tpu.dimension_semantics<arbitrary>], iteration_bounds = array<i64: 1>, scalar_prefetch = 0 : i64, scratch_operands = 0 : i64, tpu.core_type = #tpu.core_type<tc>, window_params = [{pipeline_mode = #tpu.pipeline_mode<synchronous>, transform_indices = @transform_0, window_bounds = array<i64: 2, 8, 4>}, {pipeline_mode = #tpu.pipeline_mode<synchronous>, transform_indices = @transform_1, window_bounds = array<i64: 2, 128>}, {pipeline_mode = #tpu.pipeline_mode<synchronous>, transform_indices = @transform_2, window_bounds = array<i64: 4, 384>}, {pipeline_mode = #tpu.pipeline_mode<synchronous>, transform_indices = @transform_3, window_bounds = array<i64: 128, 384>}, {pipeline_mode = #tpu.pipeline_mode<synchronous>, transform_indices = @transform_4, window_bounds = array<i64: 1, 384>}, {pipeline_mode = #tpu.pipeline_mode<synchronous>, transform_indices = @transform_5, window_bounds = array<i64: 1, 128>}, {pipeline_mode = #tpu.pipeline_mode<synchronous>, transform_indices = @transform_6, window_bounds = array<i64: 128, 128>}, {pipeline_mode = #tpu.pipeline_mode<synchronous>, transform_indices = @transform_7, window_bounds = array<i64: 1, 128>}, {pipeline_mode = #tpu.pipeline_mode<synchronous>, transform_indices = @transform_8, window_bounds = array<i64: 2, 128>}]} {
    %c0 = arith.constant 0 : index
    %c0_0 = arith.constant 0 : index
    %c0_1 = arith.constant 0 : index
    %0 = vector.load %arg1[%c0, %c0_0, %c0_1] : memref<2x8x4xf32, #tpu.memory_space<vmem>>, vector<2x8x4xf32>
    %1 = vector.shape_cast %0 : vector<2x8x4xf32> to vector<16x4xf32>
    %c0_2 = arith.constant 0 : index
    %c0_3 = arith.constant 0 : index
    %2 = vector.load %arg3[%c0_2, %c0_3] : memref<4x384xf32, #tpu.memory_space<vmem>>, vector<4x384xf32>
    %cst = arith.constant dense<0.000000e+00> : vector<16x384xf32>
    %3 = tpu.matmul %1, %2, %cst {dimension_numbers = #tpu.dot_dimension_numbers<[1], [0], [0], [1], [0, 0, 1, 1], [], []>} : vector<16x4xf32>, vector<4x384xf32>, vector<16x384xf32> -> vector<16x384xf32>
    %c0_4 = arith.constant 0 : index
    %c0_5 = arith.constant 0 : index
    %4 = vector.load %arg5[%c0_4, %c0_5] : memref<1x384xf32, #tpu.memory_space<vmem>>, vector<1x384xf32>
    %5 = vector.broadcast %4 : vector<1x384xf32> to vector<16x384xf32>
    %6 = arith.addf %3, %5 : vector<16x384xf32>
    %7 = vector.shape_cast %6 : vector<16x384xf32> to vector<2x8x384xf32>
    %c0_6 = arith.constant 0 : index
    %c0_7 = arith.constant 0 : index
    %8 = vector.load %arg4[%c0_6, %c0_7] : memref<128x384xf32, #tpu.memory_space<vmem>>, vector<128x384xf32>
    %c0_8 = arith.constant 0 : index
    %c0_9 = arith.constant 0 : index
    %9 = vector.load %arg6[%c0_8, %c0_9] : memref<1x128xf32, #tpu.memory_space<vmem>>, vector<1x128xf32>
    %c0_10 = arith.constant 0 : index
    %c0_11 = arith.constant 0 : index
    %10 = vector.load %arg2[%c0_10, %c0_11] : memref<2x128xf32, #tpu.memory_space<vmem>>, vector<2x128xf32>
    %11 = vector.extract_strided_slice %7 {offsets = [0, 0, 0], sizes = [2, 1, 384], strides = [1, 1, 1]} : vector<2x8x384xf32> to vector<2x1x384xf32>
    %12 = vector.shape_cast %11 : vector<2x1x384xf32> to vector<2x384xf32>
    %cst_12 = arith.constant dense<0.000000e+00> : vector<2x384xf32>
    %13 = tpu.matmul %10, %8, %cst_12 {dimension_numbers = #tpu.dot_dimension_numbers<[1], [0], [0], [1], [0, 0, 1, 1], [], []>} : vector<2x128xf32>, vector<128x384xf32>, vector<2x384xf32> -> vector<2x384xf32>
    %14 = vector.extract_strided_slice %12 {offsets = [0, 0], sizes = [2, 128], strides = [1, 1]} : vector<2x384xf32> to vector<2x128xf32>
    %15 = vector.extract_strided_slice %13 {offsets = [0, 0], sizes = [2, 128], strides = [1, 1]} : vector<2x384xf32> to vector<2x128xf32>
    %16 = arith.addf %14, %15 : vector<2x128xf32>
    %17 = arith.negf %16 : vector<2x128xf32>
    %18 = math.exp %17 : vector<2x128xf32>
    %cst_13 = arith.constant 1.000000e+00 : f32
    %19 = vector.broadcast %cst_13 : f32 to vector<2x128xf32>
    %20 = arith.addf %19, %18 : vector<2x128xf32>
    %21 = arith.divf %19, %20 : vector<2x128xf32>
    %22 = vector.extract_strided_slice %12 {offsets = [0, 128], sizes = [2, 128], strides = [1, 1]} : vector<2x384xf32> to vector<2x128xf32>
    %23 = vector.extract_strided_slice %13 {offsets = [0, 128], sizes = [2, 128], strides = [1, 1]} : vector<2x384xf32> to vector<2x128xf32>
    %24 = arith.addf %22, %23 : vector<2x128xf32>
    %25 = arith.negf %24 : vector<2x128xf32>
    %26 = math.exp %25 : vector<2x128xf32>
    %cst_14 = arith.constant 1.000000e+00 : f32
    %27 = vector.broadcast %cst_14 : f32 to vector<2x128xf32>
    %28 = arith.addf %27, %26 : vector<2x128xf32>
    %29 = arith.divf %27, %28 : vector<2x128xf32>
    %30 = vector.extract_strided_slice %12 {offsets = [0, 256], sizes = [2, 128], strides = [1, 1]} : vector<2x384xf32> to vector<2x128xf32>
    %31 = vector.extract_strided_slice %13 {offsets = [0, 256], sizes = [2, 128], strides = [1, 1]} : vector<2x384xf32> to vector<2x128xf32>
    %32 = vector.broadcast %9 : vector<1x128xf32> to vector<2x128xf32>
    %33 = arith.addf %31, %32 : vector<2x128xf32>
    %34 = arith.mulf %21, %33 : vector<2x128xf32>
    %35 = arith.addf %30, %34 : vector<2x128xf32>
    %36 = math.tanh %35 : vector<2x128xf32>
    %cst_15 = arith.constant 1.000000e+00 : f32
    %37 = vector.broadcast %cst_15 : f32 to vector<2x128xf32>
    %38 = arith.subf %37, %29 : vector<2x128xf32>
    %39 = arith.mulf %38, %36 : vector<2x128xf32>
    %40 = arith.mulf %29, %10 : vector<2x128xf32>
    %41 = arith.addf %39, %40 : vector<2x128xf32>
    %42 = vector.extract_strided_slice %7 {offsets = [0, 1, 0], sizes = [2, 1, 384], strides = [1, 1, 1]} : vector<2x8x384xf32> to vector<2x1x384xf32>
    %43 = vector.shape_cast %42 : vector<2x1x384xf32> to vector<2x384xf32>
    %cst_16 = arith.constant dense<0.000000e+00> : vector<2x384xf32>
    %44 = tpu.matmul %41, %8, %cst_16 {dimension_numbers = #tpu.dot_dimension_numbers<[1], [0], [0], [1], [0, 0, 1, 1], [], []>} : vector<2x128xf32>, vector<128x384xf32>, vector<2x384xf32> -> vector<2x384xf32>
    %45 = vector.extract_strided_slice %43 {offsets = [0, 0], sizes = [2, 128], strides = [1, 1]} : vector<2x384xf32> to vector<2x128xf32>
    %46 = vector.extract_strided_slice %44 {offsets = [0, 0], sizes = [2, 128], strides = [1, 1]} : vector<2x384xf32> to vector<2x128xf32>
    %47 = arith.addf %45, %46 : vector<2x128xf32>
    %48 = arith.negf %47 : vector<2x128xf32>
    %49 = math.exp %48 : vector<2x128xf32>
    %cst_17 = arith.constant 1.000000e+00 : f32
    %50 = vector.broadcast %cst_17 : f32 to vector<2x128xf32>
    %51 = arith.addf %50, %49 : vector<2x128xf32>
    %52 = arith.divf %50, %51 : vector<2x128xf32>
    %53 = vector.extract_strided_slice %43 {offsets = [0, 128], sizes = [2, 128], strides = [1, 1]} : vector<2x384xf32> to vector<2x128xf32>
    %54 = vector.extract_strided_slice %44 {offsets = [0, 128], sizes = [2, 128], strides = [1, 1]} : vector<2x384xf32> to vector<2x128xf32>
    %55 = arith.addf %53, %54 : vector<2x128xf32>
    %56 = arith.negf %55 : vector<2x128xf32>
    %57 = math.exp %56 : vector<2x128xf32>
    %cst_18 = arith.constant 1.000000e+00 : f32
    %58 = vector.broadcast %cst_18 : f32 to vector<2x128xf32>
    %59 = arith.addf %58, %57 : vector<2x128xf32>
    %60 = arith.divf %58, %59 : vector<2x128xf32>
    %61 = vector.extract_strided_slice %43 {offsets = [0, 256], sizes = [2, 128], strides = [1, 1]} : vector<2x384xf32> to vector<2x128xf32>
    %62 = vector.extract_strided_slice %44 {offsets = [0, 256], sizes = [2, 128], strides = [1, 1]} : vector<2x384xf32> to vector<2x128xf32>
    %63 = vector.broadcast %9 : vector<1x128xf32> to vector<2x128xf32>
    %64 = arith.addf %62, %63 : vector<2x128xf32>
    %65 = arith.mulf %52, %64 : vector<2x128xf32>
    %66 = arith.addf %61, %65 : vector<2x128xf32>
    %67 = math.tanh %66 : vector<2x128xf32>
    %cst_19 = arith.constant 1.000000e+00 : f32
    %68 = vector.broadcast %cst_19 : f32 to vector<2x128xf32>
    %69 = arith.subf %68, %60 : vector<2x128xf32>
    %70 = arith.mulf %69, %67 : vector<2x128xf32>
    %71 = arith.mulf %60, %41 : vector<2x128xf32>
    %72 = arith.addf %70, %71 : vector<2x128xf32>
    %73 = vector.extract_strided_slice %7 {offsets = [0, 2, 0], sizes = [2, 1, 384], strides = [1, 1, 1]} : vector<2x8x384xf32> to vector<2x1x384xf32>
    %74 = vector.shape_cast %73 : vector<2x1x384xf32> to vector<2x384xf32>
    %cst_20 = arith.constant dense<0.000000e+00> : vector<2x384xf32>
    %75 = tpu.matmul %72, %8, %cst_20 {dimension_numbers = #tpu.dot_dimension_numbers<[1], [0], [0], [1], [0, 0, 1, 1], [], []>} : vector<2x128xf32>, vector<128x384xf32>, vector<2x384xf32> -> vector<2x384xf32>
    %76 = vector.extract_strided_slice %74 {offsets = [0, 0], sizes = [2, 128], strides = [1, 1]} : vector<2x384xf32> to vector<2x128xf32>
    %77 = vector.extract_strided_slice %75 {offsets = [0, 0], sizes = [2, 128], strides = [1, 1]} : vector<2x384xf32> to vector<2x128xf32>
    %78 = arith.addf %76, %77 : vector<2x128xf32>
    %79 = arith.negf %78 : vector<2x128xf32>
    %80 = math.exp %79 : vector<2x128xf32>
    %cst_21 = arith.constant 1.000000e+00 : f32
    %81 = vector.broadcast %cst_21 : f32 to vector<2x128xf32>
    %82 = arith.addf %81, %80 : vector<2x128xf32>
    %83 = arith.divf %81, %82 : vector<2x128xf32>
    %84 = vector.extract_strided_slice %74 {offsets = [0, 128], sizes = [2, 128], strides = [1, 1]} : vector<2x384xf32> to vector<2x128xf32>
    %85 = vector.extract_strided_slice %75 {offsets = [0, 128], sizes = [2, 128], strides = [1, 1]} : vector<2x384xf32> to vector<2x128xf32>
    %86 = arith.addf %84, %85 : vector<2x128xf32>
    %87 = arith.negf %86 : vector<2x128xf32>
    %88 = math.exp %87 : vector<2x128xf32>
    %cst_22 = arith.constant 1.000000e+00 : f32
    %89 = vector.broadcast %cst_22 : f32 to vector<2x128xf32>
    %90 = arith.addf %89, %88 : vector<2x128xf32>
    %91 = arith.divf %89, %90 : vector<2x128xf32>
    %92 = vector.extract_strided_slice %74 {offsets = [0, 256], sizes = [2, 128], strides = [1, 1]} : vector<2x384xf32> to vector<2x128xf32>
    %93 = vector.extract_strided_slice %75 {offsets = [0, 256], sizes = [2, 128], strides = [1, 1]} : vector<2x384xf32> to vector<2x128xf32>
    %94 = vector.broadcast %9 : vector<1x128xf32> to vector<2x128xf32>
    %95 = arith.addf %93, %94 : vector<2x128xf32>
    %96 = arith.mulf %83, %95 : vector<2x128xf32>
    %97 = arith.addf %92, %96 : vector<2x128xf32>
    %98 = math.tanh %97 : vector<2x128xf32>
    %cst_23 = arith.constant 1.000000e+00 : f32
    %99 = vector.broadcast %cst_23 : f32 to vector<2x128xf32>
    %100 = arith.subf %99, %91 : vector<2x128xf32>
    %101 = arith.mulf %100, %98 : vector<2x128xf32>
    %102 = arith.mulf %91, %72 : vector<2x128xf32>
    %103 = arith.addf %101, %102 : vector<2x128xf32>
    %104 = vector.extract_strided_slice %7 {offsets = [0, 3, 0], sizes = [2, 1, 384], strides = [1, 1, 1]} : vector<2x8x384xf32> to vector<2x1x384xf32>
    %105 = vector.shape_cast %104 : vector<2x1x384xf32> to vector<2x384xf32>
    %cst_24 = arith.constant dense<0.000000e+00> : vector<2x384xf32>
    %106 = tpu.matmul %103, %8, %cst_24 {dimension_numbers = #tpu.dot_dimension_numbers<[1], [0], [0], [1], [0, 0, 1, 1], [], []>} : vector<2x128xf32>, vector<128x384xf32>, vector<2x384xf32> -> vector<2x384xf32>
    %107 = vector.extract_strided_slice %105 {offsets = [0, 0], sizes = [2, 128], strides = [1, 1]} : vector<2x384xf32> to vector<2x128xf32>
    %108 = vector.extract_strided_slice %106 {offsets = [0, 0], sizes = [2, 128], strides = [1, 1]} : vector<2x384xf32> to vector<2x128xf32>
    %109 = arith.addf %107, %108 : vector<2x128xf32>
    %110 = arith.negf %109 : vector<2x128xf32>
    %111 = math.exp %110 : vector<2x128xf32>
    %cst_25 = arith.constant 1.000000e+00 : f32
    %112 = vector.broadcast %cst_25 : f32 to vector<2x128xf32>
    %113 = arith.addf %112, %111 : vector<2x128xf32>
    %114 = arith.divf %112, %113 : vector<2x128xf32>
    %115 = vector.extract_strided_slice %105 {offsets = [0, 128], sizes = [2, 128], strides = [1, 1]} : vector<2x384xf32> to vector<2x128xf32>
    %116 = vector.extract_strided_slice %106 {offsets = [0, 128], sizes = [2, 128], strides = [1, 1]} : vector<2x384xf32> to vector<2x128xf32>
    %117 = arith.addf %115, %116 : vector<2x128xf32>
    %118 = arith.negf %117 : vector<2x128xf32>
    %119 = math.exp %118 : vector<2x128xf32>
    %cst_26 = arith.constant 1.000000e+00 : f32
    %120 = vector.broadcast %cst_26 : f32 to vector<2x128xf32>
    %121 = arith.addf %120, %119 : vector<2x128xf32>
    %122 = arith.divf %120, %121 : vector<2x128xf32>
    %123 = vector.extract_strided_slice %105 {offsets = [0, 256], sizes = [2, 128], strides = [1, 1]} : vector<2x384xf32> to vector<2x128xf32>
    %124 = vector.extract_strided_slice %106 {offsets = [0, 256], sizes = [2, 128], strides = [1, 1]} : vector<2x384xf32> to vector<2x128xf32>
    %125 = vector.broadcast %9 : vector<1x128xf32> to vector<2x128xf32>
    %126 = arith.addf %124, %125 : vector<2x128xf32>
    %127 = arith.mulf %114, %126 : vector<2x128xf32>
    %128 = arith.addf %123, %127 : vector<2x128xf32>
    %129 = math.tanh %128 : vector<2x128xf32>
    %cst_27 = arith.constant 1.000000e+00 : f32
    %130 = vector.broadcast %cst_27 : f32 to vector<2x128xf32>
    %131 = arith.subf %130, %122 : vector<2x128xf32>
    %132 = arith.mulf %131, %129 : vector<2x128xf32>
    %133 = arith.mulf %122, %103 : vector<2x128xf32>
    %134 = arith.addf %132, %133 : vector<2x128xf32>
    %135 = vector.extract_strided_slice %7 {offsets = [0, 4, 0], sizes = [2, 1, 384], strides = [1, 1, 1]} : vector<2x8x384xf32> to vector<2x1x384xf32>
    %136 = vector.shape_cast %135 : vector<2x1x384xf32> to vector<2x384xf32>
    %cst_28 = arith.constant dense<0.000000e+00> : vector<2x384xf32>
    %137 = tpu.matmul %134, %8, %cst_28 {dimension_numbers = #tpu.dot_dimension_numbers<[1], [0], [0], [1], [0, 0, 1, 1], [], []>} : vector<2x128xf32>, vector<128x384xf32>, vector<2x384xf32> -> vector<2x384xf32>
    %138 = vector.extract_strided_slice %136 {offsets = [0, 0], sizes = [2, 128], strides = [1, 1]} : vector<2x384xf32> to vector<2x128xf32>
    %139 = vector.extract_strided_slice %137 {offsets = [0, 0], sizes = [2, 128], strides = [1, 1]} : vector<2x384xf32> to vector<2x128xf32>
    %140 = arith.addf %138, %139 : vector<2x128xf32>
    %141 = arith.negf %140 : vector<2x128xf32>
    %142 = math.exp %141 : vector<2x128xf32>
    %cst_29 = arith.constant 1.000000e+00 : f32
    %143 = vector.broadcast %cst_29 : f32 to vector<2x128xf32>
    %144 = arith.addf %143, %142 : vector<2x128xf32>
    %145 = arith.divf %143, %144 : vector<2x128xf32>
    %146 = vector.extract_strided_slice %136 {offsets = [0, 128], sizes = [2, 128], strides = [1, 1]} : vector<2x384xf32> to vector<2x128xf32>
    %147 = vector.extract_strided_slice %137 {offsets = [0, 128], sizes = [2, 128], strides = [1, 1]} : vector<2x384xf32> to vector<2x128xf32>
    %148 = arith.addf %146, %147 : vector<2x128xf32>
    %149 = arith.negf %148 : vector<2x128xf32>
    %150 = math.exp %149 : vector<2x128xf32>
    %cst_30 = arith.constant 1.000000e+00 : f32
    %151 = vector.broadcast %cst_30 : f32 to vector<2x128xf32>
    %152 = arith.addf %151, %150 : vector<2x128xf32>
    %153 = arith.divf %151, %152 : vector<2x128xf32>
    %154 = vector.extract_strided_slice %136 {offsets = [0, 256], sizes = [2, 128], strides = [1, 1]} : vector<2x384xf32> to vector<2x128xf32>
    %155 = vector.extract_strided_slice %137 {offsets = [0, 256], sizes = [2, 128], strides = [1, 1]} : vector<2x384xf32> to vector<2x128xf32>
    %156 = vector.broadcast %9 : vector<1x128xf32> to vector<2x128xf32>
    %157 = arith.addf %155, %156 : vector<2x128xf32>
    %158 = arith.mulf %145, %157 : vector<2x128xf32>
    %159 = arith.addf %154, %158 : vector<2x128xf32>
    %160 = math.tanh %159 : vector<2x128xf32>
    %cst_31 = arith.constant 1.000000e+00 : f32
    %161 = vector.broadcast %cst_31 : f32 to vector<2x128xf32>
    %162 = arith.subf %161, %153 : vector<2x128xf32>
    %163 = arith.mulf %162, %160 : vector<2x128xf32>
    %164 = arith.mulf %153, %134 : vector<2x128xf32>
    %165 = arith.addf %163, %164 : vector<2x128xf32>
    %166 = vector.extract_strided_slice %7 {offsets = [0, 5, 0], sizes = [2, 1, 384], strides = [1, 1, 1]} : vector<2x8x384xf32> to vector<2x1x384xf32>
    %167 = vector.shape_cast %166 : vector<2x1x384xf32> to vector<2x384xf32>
    %cst_32 = arith.constant dense<0.000000e+00> : vector<2x384xf32>
    %168 = tpu.matmul %165, %8, %cst_32 {dimension_numbers = #tpu.dot_dimension_numbers<[1], [0], [0], [1], [0, 0, 1, 1], [], []>} : vector<2x128xf32>, vector<128x384xf32>, vector<2x384xf32> -> vector<2x384xf32>
    %169 = vector.extract_strided_slice %167 {offsets = [0, 0], sizes = [2, 128], strides = [1, 1]} : vector<2x384xf32> to vector<2x128xf32>
    %170 = vector.extract_strided_slice %168 {offsets = [0, 0], sizes = [2, 128], strides = [1, 1]} : vector<2x384xf32> to vector<2x128xf32>
    %171 = arith.addf %169, %170 : vector<2x128xf32>
    %172 = arith.negf %171 : vector<2x128xf32>
    %173 = math.exp %172 : vector<2x128xf32>
    %cst_33 = arith.constant 1.000000e+00 : f32
    %174 = vector.broadcast %cst_33 : f32 to vector<2x128xf32>
    %175 = arith.addf %174, %173 : vector<2x128xf32>
    %176 = arith.divf %174, %175 : vector<2x128xf32>
    %177 = vector.extract_strided_slice %167 {offsets = [0, 128], sizes = [2, 128], strides = [1, 1]} : vector<2x384xf32> to vector<2x128xf32>
    %178 = vector.extract_strided_slice %168 {offsets = [0, 128], sizes = [2, 128], strides = [1, 1]} : vector<2x384xf32> to vector<2x128xf32>
    %179 = arith.addf %177, %178 : vector<2x128xf32>
    %180 = arith.negf %179 : vector<2x128xf32>
    %181 = math.exp %180 : vector<2x128xf32>
    %cst_34 = arith.constant 1.000000e+00 : f32
    %182 = vector.broadcast %cst_34 : f32 to vector<2x128xf32>
    %183 = arith.addf %182, %181 : vector<2x128xf32>
    %184 = arith.divf %182, %183 : vector<2x128xf32>
    %185 = vector.extract_strided_slice %167 {offsets = [0, 256], sizes = [2, 128], strides = [1, 1]} : vector<2x384xf32> to vector<2x128xf32>
    %186 = vector.extract_strided_slice %168 {offsets = [0, 256], sizes = [2, 128], strides = [1, 1]} : vector<2x384xf32> to vector<2x128xf32>
    %187 = vector.broadcast %9 : vector<1x128xf32> to vector<2x128xf32>
    %188 = arith.addf %186, %187 : vector<2x128xf32>
    %189 = arith.mulf %176, %188 : vector<2x128xf32>
    %190 = arith.addf %185, %189 : vector<2x128xf32>
    %191 = math.tanh %190 : vector<2x128xf32>
    %cst_35 = arith.constant 1.000000e+00 : f32
    %192 = vector.broadcast %cst_35 : f32 to vector<2x128xf32>
    %193 = arith.subf %192, %184 : vector<2x128xf32>
    %194 = arith.mulf %193, %191 : vector<2x128xf32>
    %195 = arith.mulf %184, %165 : vector<2x128xf32>
    %196 = arith.addf %194, %195 : vector<2x128xf32>
    %197 = vector.extract_strided_slice %7 {offsets = [0, 6, 0], sizes = [2, 1, 384], strides = [1, 1, 1]} : vector<2x8x384xf32> to vector<2x1x384xf32>
    %198 = vector.shape_cast %197 : vector<2x1x384xf32> to vector<2x384xf32>
    %cst_36 = arith.constant dense<0.000000e+00> : vector<2x384xf32>
    %199 = tpu.matmul %196, %8, %cst_36 {dimension_numbers = #tpu.dot_dimension_numbers<[1], [0], [0], [1], [0, 0, 1, 1], [], []>} : vector<2x128xf32>, vector<128x384xf32>, vector<2x384xf32> -> vector<2x384xf32>
    %200 = vector.extract_strided_slice %198 {offsets = [0, 0], sizes = [2, 128], strides = [1, 1]} : vector<2x384xf32> to vector<2x128xf32>
    %201 = vector.extract_strided_slice %199 {offsets = [0, 0], sizes = [2, 128], strides = [1, 1]} : vector<2x384xf32> to vector<2x128xf32>
    %202 = arith.addf %200, %201 : vector<2x128xf32>
    %203 = arith.negf %202 : vector<2x128xf32>
    %204 = math.exp %203 : vector<2x128xf32>
    %cst_37 = arith.constant 1.000000e+00 : f32
    %205 = vector.broadcast %cst_37 : f32 to vector<2x128xf32>
    %206 = arith.addf %205, %204 : vector<2x128xf32>
    %207 = arith.divf %205, %206 : vector<2x128xf32>
    %208 = vector.extract_strided_slice %198 {offsets = [0, 128], sizes = [2, 128], strides = [1, 1]} : vector<2x384xf32> to vector<2x128xf32>
    %209 = vector.extract_strided_slice %199 {offsets = [0, 128], sizes = [2, 128], strides = [1, 1]} : vector<2x384xf32> to vector<2x128xf32>
    %210 = arith.addf %208, %209 : vector<2x128xf32>
    %211 = arith.negf %210 : vector<2x128xf32>
    %212 = math.exp %211 : vector<2x128xf32>
    %cst_38 = arith.constant 1.000000e+00 : f32
    %213 = vector.broadcast %cst_38 : f32 to vector<2x128xf32>
    %214 = arith.addf %213, %212 : vector<2x128xf32>
    %215 = arith.divf %213, %214 : vector<2x128xf32>
    %216 = vector.extract_strided_slice %198 {offsets = [0, 256], sizes = [2, 128], strides = [1, 1]} : vector<2x384xf32> to vector<2x128xf32>
    %217 = vector.extract_strided_slice %199 {offsets = [0, 256], sizes = [2, 128], strides = [1, 1]} : vector<2x384xf32> to vector<2x128xf32>
    %218 = vector.broadcast %9 : vector<1x128xf32> to vector<2x128xf32>
    %219 = arith.addf %217, %218 : vector<2x128xf32>
    %220 = arith.mulf %207, %219 : vector<2x128xf32>
    %221 = arith.addf %216, %220 : vector<2x128xf32>
    %222 = math.tanh %221 : vector<2x128xf32>
    %cst_39 = arith.constant 1.000000e+00 : f32
    %223 = vector.broadcast %cst_39 : f32 to vector<2x128xf32>
    %224 = arith.subf %223, %215 : vector<2x128xf32>
    %225 = arith.mulf %224, %222 : vector<2x128xf32>
    %226 = arith.mulf %215, %196 : vector<2x128xf32>
    %227 = arith.addf %225, %226 : vector<2x128xf32>
    %228 = vector.extract_strided_slice %7 {offsets = [0, 7, 0], sizes = [2, 1, 384], strides = [1, 1, 1]} : vector<2x8x384xf32> to vector<2x1x384xf32>
    %229 = vector.shape_cast %228 : vector<2x1x384xf32> to vector<2x384xf32>
    %cst_40 = arith.constant dense<0.000000e+00> : vector<2x384xf32>
    %230 = tpu.matmul %227, %8, %cst_40 {dimension_numbers = #tpu.dot_dimension_numbers<[1], [0], [0], [1], [0, 0, 1, 1], [], []>} : vector<2x128xf32>, vector<128x384xf32>, vector<2x384xf32> -> vector<2x384xf32>
    %231 = vector.extract_strided_slice %229 {offsets = [0, 0], sizes = [2, 128], strides = [1, 1]} : vector<2x384xf32> to vector<2x128xf32>
    %232 = vector.extract_strided_slice %230 {offsets = [0, 0], sizes = [2, 128], strides = [1, 1]} : vector<2x384xf32> to vector<2x128xf32>
    %233 = arith.addf %231, %232 : vector<2x128xf32>
    %234 = arith.negf %233 : vector<2x128xf32>
    %235 = math.exp %234 : vector<2x128xf32>
    %cst_41 = arith.constant 1.000000e+00 : f32
    %236 = vector.broadcast %cst_41 : f32 to vector<2x128xf32>
    %237 = arith.addf %236, %235 : vector<2x128xf32>
    %238 = arith.divf %236, %237 : vector<2x128xf32>
    %239 = vector.extract_strided_slice %229 {offsets = [0, 128], sizes = [2, 128], strides = [1, 1]} : vector<2x384xf32> to vector<2x128xf32>
    %240 = vector.extract_strided_slice %230 {offsets = [0, 128], sizes = [2, 128], strides = [1, 1]} : vector<2x384xf32> to vector<2x128xf32>
    %241 = arith.addf %239, %240 : vector<2x128xf32>
    %242 = arith.negf %241 : vector<2x128xf32>
    %243 = math.exp %242 : vector<2x128xf32>
    %cst_42 = arith.constant 1.000000e+00 : f32
    %244 = vector.broadcast %cst_42 : f32 to vector<2x128xf32>
    %245 = arith.addf %244, %243 : vector<2x128xf32>
    %246 = arith.divf %244, %245 : vector<2x128xf32>
    %247 = vector.extract_strided_slice %229 {offsets = [0, 256], sizes = [2, 128], strides = [1, 1]} : vector<2x384xf32> to vector<2x128xf32>
    %248 = vector.extract_strided_slice %230 {offsets = [0, 256], sizes = [2, 128], strides = [1, 1]} : vector<2x384xf32> to vector<2x128xf32>
    %249 = vector.broadcast %9 : vector<1x128xf32> to vector<2x128xf32>
    %250 = arith.addf %248, %249 : vector<2x128xf32>
    %251 = arith.mulf %238, %250 : vector<2x128xf32>
    %252 = arith.addf %247, %251 : vector<2x128xf32>
    %253 = math.tanh %252 : vector<2x128xf32>
    %cst_43 = arith.constant 1.000000e+00 : f32
    %254 = vector.broadcast %cst_43 : f32 to vector<2x128xf32>
    %255 = arith.subf %254, %246 : vector<2x128xf32>
    %256 = arith.mulf %255, %253 : vector<2x128xf32>
    %257 = arith.mulf %246, %227 : vector<2x128xf32>
    %258 = arith.addf %256, %257 : vector<2x128xf32>
    %c0_44 = arith.constant 0 : index
    %c0_45 = arith.constant 0 : index
    %259 = vector.load %arg7[%c0_44, %c0_45] : memref<128x128xf32, #tpu.memory_space<vmem>>, vector<128x128xf32>
    %cst_46 = arith.constant dense<0.000000e+00> : vector<2x128xf32>
    %260 = tpu.matmul %258, %259, %cst_46 {dimension_numbers = #tpu.dot_dimension_numbers<[1], [0], [0], [1], [0, 0, 1, 1], [], []>} : vector<2x128xf32>, vector<128x128xf32>, vector<2x128xf32> -> vector<2x128xf32>
    %c0_47 = arith.constant 0 : index
    %c0_48 = arith.constant 0 : index
    %261 = vector.load %arg8[%c0_47, %c0_48] : memref<1x128xf32, #tpu.memory_space<vmem>>, vector<1x128xf32>
    %262 = vector.broadcast %261 : vector<1x128xf32> to vector<2x128xf32>
    %263 = arith.addf %260, %262 : vector<2x128xf32>
    %264 = arith.negf %263 : vector<2x128xf32>
    %265 = math.exp %264 : vector<2x128xf32>
    %cst_49 = arith.constant 1.000000e+00 : f32
    %266 = vector.broadcast %cst_49 : f32 to vector<2x128xf32>
    %267 = arith.addf %266, %265 : vector<2x128xf32>
    %268 = arith.divf %266, %267 : vector<2x128xf32>
    %c0_50 = arith.constant 0 : index
    %c0_51 = arith.constant 0 : index
    %269 = vector.load %arg9[%c0_50, %c0_51] : memref<2x128xf32, #tpu.memory_space<vmem>>, vector<2x128xf32>
    tpu.vector_store %arg9[%c0_50, %c0_51], %268 {strides = array<i32>} : memref<2x128xf32, #tpu.memory_space<vmem>>, vector<2x128xf32>,
    return
  }
  func.func @transform_0(%arg0: i32) -> (i32, i32, i32) {
    %c0_i32 = arith.constant 0 : i32
    %c0_i32_0 = arith.constant 0 : i32
    %c0_i32_1 = arith.constant 0 : i32
    %c0_i32_2 = arith.constant 0 : i32
    return %c0_i32, %c0_i32_0, %c0_i32_1 : i32, i32, i32
  }
  func.func @transform_1(%arg0: i32) -> (i32, i32) {
    %c0_i32 = arith.constant 0 : i32
    %c0_i32_0 = arith.constant 0 : i32
    %c0_i32_1 = arith.constant 0 : i32
    return %c0_i32, %c0_i32_0 : i32, i32
  }
  func.func @transform_2(%arg0: i32) -> (i32, i32) {
    %c0_i32 = arith.constant 0 : i32
    %c0_i32_0 = arith.constant 0 : i32
    %c0_i32_1 = arith.constant 0 : i32
    return %c0_i32, %c0_i32_0 : i32, i32
  }
  func.func @transform_3(%arg0: i32) -> (i32, i32) {
    %c0_i32 = arith.constant 0 : i32
    %c0_i32_0 = arith.constant 0 : i32
    %c0_i32_1 = arith.constant 0 : i32
    return %c0_i32, %c0_i32_0 : i32, i32
  }
  func.func @transform_4(%arg0: i32) -> (i32, i32) {
    %c0_i32 = arith.constant 0 : i32
    %c0_i32_0 = arith.constant 0 : i32
    %c0_i32_1 = arith.constant 0 : i32
    return %c0_i32, %c0_i32_0 : i32, i32
  }
  func.func @transform_5(%arg0: i32) -> (i32, i32) {
    %c0_i32 = arith.constant 0 : i32
    %c0_i32_0 = arith.constant 0 : i32
    %c0_i32_1 = arith.constant 0 : i32
    return %c0_i32, %c0_i32_0 : i32, i32
  }
  func.func @transform_6(%arg0: i32) -> (i32, i32) {
    %c0_i32 = arith.constant 0 : i32
    %c0_i32_0 = arith.constant 0 : i32
    %c0_i32_1 = arith.constant 0 : i32
    return %c0_i32, %c0_i32_0 : i32, i32
  }
  func.func @transform_7(%arg0: i32) -> (i32, i32) {
    %c0_i32 = arith.constant 0 : i32
    %c0_i32_0 = arith.constant 0 : i32
    %c0_i32_1 = arith.constant 0 : i32
    return %c0_i32, %c0_i32_0 : i32, i32
  }
  func.func @transform_8(%arg0: i32) -> (i32, i32) {
    %c0_i32 = arith.constant 0 : i32
    %c0_i32_0 = arith.constant 0 : i32
    %c0_i32_1 = arith.constant 0 : i32
    return %c0_i32, %c0_i32_0 : i32, i32
  }
}

</mosaic_0001>

<bundles_post_ra>
// kernel: tpu_custom_call.1
= control target key start
LH: loop header
LB: loop body
LE: loop exit
PB: predicated region body
PF: predicated region fallthrough
CT: control target
= control target key end

     0   :  { %13 = vsyncpa [#allocation3], 0  ;;  %s3933_s0 = inlined_call_operand.vmem [shape: f32[2,8,4], index: 0, kind: input, shape index: {}]   ;;  %s3934_s1 = inlined_call_operand.vmem [shape: f32[2,128], index: 1, kind: input, shape index: {}]   ;;  %s3935_s2 = inlined_call_operand.vmem [shape: f32[4,384], index: 2, kind: input, shape index: {}]   ;;  %s3936_s3 = inlined_call_operand.hbm [shape: f32[128,384], index: 3, kind: input, shape index: {}]   ;;  %s3937_s4 = inlined_call_operand.vmem [shape: f32[1,384], index: 4, kind: input, shape index: {}]   ;;  %s3938_s5 = inlined_call_operand.vmem [shape: f32[1,128], index: 5, kind: input, shape index: {}]   ;;  %s3939_s6 = inlined_call_operand.hbm [shape: f32[128,128], index: 6, kind: input, shape index: {}]   ;;  %s3940_s7 = inlined_call_operand.vmem [shape: f32[1,128], index: 7, kind: input, shape index: {}]   ;;  %s3941_s8 = inlined_call_operand.hbm [shape: f32[2,128], index: 8, kind: output, shape index: {}]  }
   0x1   :  { %14 = vsyncpa [#allocation6], 0 }
   0x2   :  { %15 = vsyncpa [#allocation4], 0  ;;  %s3322_s27 = smov [#allocation2]   ;;  %s3250_s9 = scalar_lea.hbm %s3936_s3, 6144 }
   0x3   :  { %s27_s28 = sshll.u32 %s3322_s27, 4  ;;  %p3251_p0 = scmp.ne.s32.totalorder %s3936_s3, %s3250_s9  ;;  %s28_s28 = int_to_ptr.vmem [resolvable:$true] %s27_s28 }
   0x4   :  { %p3254_p1 = scmp.lt.u32.totalorder %s3250_s9, %s3936_s3 }
   0x6   :  { %p3256_p2 = pnand %p3254_p1, %p3251_p0 }
   0x8   :  { %3259 = shalt.err (!%p3256_p2)
}
   0x9   :  { %s3260_s14 = scalar_lea.vmem %s28_s28, 6144  ;;  %p3265_p4 = scmp.lt.s32.totalorder %s28_s28, %s28_s28 }
   0xa   :  { %p3261_p3 = scmp.ne.s32.totalorder %s28_s28, %s3260_s14  ;;  %p3266_p5 = scmp.lt.s32.totalorder %s3260_s14, %s3260_s14 }
   0xc   :  { %p3267_p6 = por %p3266_p5, %p3265_p4 }
   0xe   :  { %p3268_p7 = pnand %p3267_p6, %p3261_p3 }
  0x10   :  { %3271 = shalt.err (!%p3268_p7)
}
  0x11   :  { %s3323_s15 = smov 384   ;;  %s3324_s16 = smov 24  }
  0x12   :  { %33 = dma.hbm_to_vmem [thread:$0]  %s3936_s3, 6144, %s28_s28, [#allocation3], %s3323_s15, %s3323_s15, %s3324_s16  }
  0x13   :  { %s3325_s19 = smov [#allocation5]   ;;  %s3272_s23 = scalar_lea.hbm %s3939_s6, 2048 }
  0x14   :  { %s43_s20 = sshll.u32 %s3325_s19, 4  ;;  %p3273_p8 = scmp.ne.s32.totalorder %s3939_s6, %s3272_s23  ;;  %s44_s20 = int_to_ptr.vmem [resolvable:$true] %s43_s20 }
  0x15   :  { %p3276_p9 = scmp.lt.u32.totalorder %s3272_s23, %s3939_s6 }
  0x17   :  { %p3278_p10 = pnand %p3276_p9, %p3273_p8 }
  0x19   :  { %3281 = shalt.err (!%p3278_p10)
}
  0x1a   :  { %s3282_s29 = scalar_lea.vmem %s44_s20, 2048  ;;  %p3287_p12 = scmp.lt.s32.totalorder %s44_s20, %s44_s20 }
  0x1b   :  { %p3283_p11 = scmp.ne.s32.totalorder %s44_s20, %s3282_s29  ;;  %p3288_p13 = scmp.lt.s32.totalorder %s3282_s29, %s3282_s29 }
  0x1d   :  { %p3289_p0 = por %p3288_p13, %p3287_p12 }
  0x1f   :  { %p3290_p1 = pnand %p3289_p0, %p3283_p11 }
  0x21   :  { %3293 = shalt.err (!%p3290_p1)
}
  0x22   :  { %s3326_s3 = smov 128   ;;  %s3327_s28 = smov 8  }
  0x23   :  { %49 = dma.hbm_to_vmem [thread:$0]  %s3939_s6, 2048, %s44_s20, [#allocation6], %s3326_s3, %s3326_s3, %s3327_s28  }
  0x24   :  { %3316 = dma.done.wait [#allocation3], 6144  }
  0x25   :  { %3317 = vsyncadd [#allocation3], 4294961152 }
  0x26   :  { %3318 = dma.done.wait [#allocation6], 2048  }
  0x27   :  { %3319 = vsyncadd [#allocation6], 4294965248  ;;  %v3328_v0 = vmov 0.0   ;;  %v249_v1 = vld [vmem:[#allocation2 + $0x8] sm:$0xff]  ;;  %v252_v2 = vld [vmem:[#allocation2 + $0x20] sm:$0xff]  ;;  %vm89_vm0 = vcmask 1043456  }
  0x28   :  { %160 = vmatprep.mubr.f32.mxu1 %v3328_v0  ;;  %362 = vmatprep.mubr.f32.mxu0 %v3328_v0  ;;  %v248_v3 = vld [vmem:[#allocation2] sm:$0xff]  ;;  %v3403_v4 = vpack.c.bf16 %v252_v2, %v249_v1  ;;  %v251_v5 = vld [vmem:[#allocation2 + $0x18] sm:$0xff]  ;;  %v258_v7 = vld [vmem:[#allocation2 + $0x50] sm:$0xff]  ;;  %vm82_vm1 = vcmask 31744   ;;  %v3329_v32 = vmov 0.0|0.0   ;;  %vm3330_vm2 = vmmov 0  }
  0x29   :  { %v255_v6 = vld [vmem:[#allocation2 + $0x38] sm:$0xff]  ;;  %v3405_v8 = vpack.c.bf16 %v251_v5, %v248_v3  ;;  %v254_v10 = vld [vmem:[#allocation2 + $0x30] sm:$0xff]  ;;  %v257_v11 = vld [vmem:[#allocation2 + $0x48] sm:$0xff]  ;;  %vm507_vm3 = vcmask 1041409   ;;  %s3331_s22 = smov [#allocation7]  }
  0x2a   :  { %v3407_v9 = vpack.c.bf16 %v258_v7, %v255_v6  ;;  %v261_v12 = vld [vmem:[#allocation2 + $0x68] sm:$0xff]  ;;  %2603 = vmatprep.subr.bf16.mxu0 %v3403_v4  ;;  %v264_v13 = vld [vmem:[#allocation2 + $0x80] sm:$0xff]  ;;  %v3411_v14 = vpack.c.bf16 %v257_v11, %v254_v10  ;;  %v263_v17 = vld [vmem:[#allocation2 + $0x78] sm:$0xff]  ;;  %s2074_s23 = sshll.u32 %s3331_s22, 4  ;;  %s2075_s23 = int_to_ptr.vmem [resolvable:$true] %s2074_s23 }
  0x2b   :  { %2605 = vmatpush1.bf16.msra.mxu0 %v3405_v8  ;;  %v3414_v15 = vpack.c.bf16 %v264_v13, %v261_v12  ;;  %v260_v16 = vld [vmem:[#allocation2 + $0x60] sm:$0xff]  ;;  %v267_v19 = vld [vmem:[#allocation2 + $0x98] sm:$0xff]  ;;  %v270_v20 = vld [vmem:[#allocation2 + $0xb0] sm:$0xff]  ;;  %s3294_s24 = scalar_lea.vmem %s2075_s23, 32  ;;  %p3299_p3 = scmp.lt.s32.totalorder %s2075_s23, %s2075_s23 }
  0x2c   :  { %2607 = vmatprep.subr.bf16.mxu0 %v3407_v9  ;;  %v60_v18 = vld [vmem:[%s3935_s2] sm:$0xff]  ;;  %v61_v23 = vld [vmem:[%s3935_s2 + $0x8] sm:$0xf]  ;;  %v3426_v24 = vpack.c.bf16 %v263_v17, %v260_v16  ;;  %v3430_v25 = vpack.c.bf16 %v270_v20, %v267_v19  ;;  %v266_v26 = vld [vmem:[#allocation2 + $0x90] sm:$0xff]  ;;  %p3295_p2 = scmp.ne.s32.totalorder %s2075_s23, %s3294_s24  ;;  %p3300_p4 = scmp.lt.s32.totalorder %s3294_s24, %s3294_s24 }
  0x2d   :  { %v81_v21 = vcombine.high %v60_v18, %v60_v18  ;;  %v58_v22 = vld [vmem:[%s3933_s0] sm:$0xff]  ;;  %v269_v27 = vld [vmem:[#allocation2 + $0xa8] sm:$0xff]  ;;  %v250_v33 = vld [vmem:[#allocation2 + $0x10] sm:$0xff] }
  0x2e   :  { %v273_v28 = vld [vmem:[#allocation2 + $0xc8] sm:$0xff]  ;;  %v276_v29 = vld [vmem:[#allocation2 + $0xe0] sm:$0xff]  ;;  %v3441_v31 = vpack.c.bf16 %v269_v27, %v266_v26  ;;  %v275_v37 = vld [vmem:[#allocation2 + $0xd8] sm:$0xff]  ;;  %p3301_p5 = por %p3300_p4, %p3299_p3 }
  0x2f   :  { %2609 = vmatpush1.bf16.msra.mxu0 %v3411_v14  ;;  %2084 = vmatprep.subr.msk.mxu1 %vm89_vm0, %v81_v21  ;;  %v59_v30 = vld [vmem:[%s3933_s0 + $0x8] sm:$0xff]  ;;  %v3445_v35 = vpack.c.bf16 %v276_v29, %v273_v28  ;;  %v272_v36 = vld [vmem:[#allocation2 + $0xc0] sm:$0xff]  ;;  %v279_v38 = vld [vmem:[#allocation2 + $0xf8] sm:$0xff]  ;;  %v64_v28 = vlaneseq }
  0x30   :  { %2611 = vmatprep.subr.bf16.mxu0 %v3414_v15  ;;  %2085 = vmatpush1.msk.msra.mxu1 %vm89_vm0, %v60_v18  ;;  %v253_v34 = vld [vmem:[#allocation2 + $0x28] sm:$0xff]  ;;  %v282_v39 = vld [vmem:[#allocation2 + $0x110] sm:$0xff]  ;;  %v3452_v41 = vpack.c.bf16 %v275_v37, %v272_v36  ;;  %v256_v42 = vld [vmem:[#allocation2 + $0x40] sm:$0xff]  ;;  %p3302_p6 = pnand %p3301_p5, %p3295_p2 }
  0x31   :  { %2086 = vmatmul.mubr.msk.f32.vlgmr.msra.gmra.mrb[0].mxu1 %vm82_vm1, %v58_v22  ;;  %2282 = vmatprep.subr.msk.mxu1 %vm89_vm0, %v61_v23  ;;  %v3449_v40 = vpack.c.bf16 %v253_v34, %v250_v33  ;;  %v259_v43 = vld [vmem:[#allocation2 + $0x58] sm:$0xff]  ;;  %v3455_v44 = vpack.c.bf16 %v282_v39, %v279_v38  ;;  %v278_v45 = vld [vmem:[#allocation2 + $0xf0] sm:$0xff]  ;;  %v281_v46 = vld [vmem:[#allocation2 + $0x108] sm:$0xff]  ;;  %v65_v33 = vshrl.u32 %v64_v28, 7 }
  0x32   :  { %2283 = vmatpush3.msk.msra.mxu1 %vm89_vm0, %v61_v23  ;;  %166 = vmatprep.mubr.f32.mxu1 %v3328_v0  ;;  %v285_v47 = vld [vmem:[#allocation2 + $0x128] sm:$0xff]  ;;  %v288_v48 = vld [vmem:[#allocation2 + $0x140] sm:$0xff]  ;;  %v3459_v49 = vpack.c.bf16 %v259_v43, %v256_v42  ;;  %v3464_v50 = vpack.c.bf16 %v281_v46, %v278_v45  ;;  %v262_v51 = vld [vmem:[#allocation2 + $0x70] sm:$0xff] }
  0x33   :  { %2613 = vmatpush1.bf16.msra.mxu0 %v3426_v24  ;;  %2634 = vmatprep.subr.bf16.mxu1 %v3329_v32  ;;  %v265_v52 = vld [vmem:[#allocation2 + $0x88] sm:$0xff]  ;;  %v3468_v53 = vpack.c.bf16 %v288_v48, %v285_v47  ;;  %v284_v54 = vld [vmem:[#allocation2 + $0x120] sm:$0xff]  ;;  %v287_v55 = vld [vmem:[#allocation2 + $0x138] sm:$0xff]  ;;  %v66_v34 = vsub.s32 0, %v65_v33  ;;  %v70_v37 = vsub.s32 1, %v65_v33 }
  0x34   :  { %2615 = vmatprep.subr.bf16.mxu0 %v3430_v25  ;;  %v291_v56 = vld [vmem:[#allocation2 + $0x158] sm:$0xff]  ;;  %v294_v57 = vld [vmem:[#allocation2 + $0x170] sm:$0xff]  ;;  %v3471_v58 = vpack.c.bf16 %v265_v52, %v262_v51  ;;  %v3474_v59 = vpack.c.bf16 %v287_v55, %v284_v54  ;;  %v268_v60 = vld [vmem:[#allocation2 + $0xa0] sm:$0xff] }
  0x35   :  { %2087 = vmatmul.mubr.msk.f32.gmra.mrb[2].mxu1 %vm82_vm1, %v59_v30  ;;  %v271_v61 = vld [vmem:[#allocation2 + $0xb8] sm:$0xff]  ;;  %v3478_v62 = vpack.c.bf16 %v294_v57, %v291_v56  ;;  %v290_v63 = vld [vmem:[#allocation2 + $0x150] sm:$0xff]  ;;  %v293_v1 = vld [vmem:[#allocation2 + $0x168] sm:$0xff] }
  0x36   :  { %2284 = vmatprep.mubr.msk.f32.mxu1 %vm82_vm1, %v58_v22  ;;  %v3481_v2 = vpack.c.bf16 %v271_v61, %v268_v60  ;;  %v3484_v3 = vpack.c.bf16 %v293_v1, %v290_v63  ;;  %v274_v5 = vld [vmem:[#allocation2 + $0xd0] sm:$0xff]  ;;  %v277_v6 = vld [vmem:[#allocation2 + $0xe8] sm:$0xff]  ;;  %v3495_v10 = vld [vmem:[%s3934_s1] sm:$0x3] }
  0x37   :  { %2617 = vmatpush1.bf16.msra.mxu0 %v3441_v31  ;;  %v3489_v7 = vpack.c.bf16 %v277_v6, %v274_v5  ;;  %v280_v11 = vld [vmem:[#allocation2 + $0x100] sm:$0xff]  ;;  %v283_v12 = vld [vmem:[#allocation2 + $0x118] sm:$0xff]  ;;  %v286_v16 = vld [vmem:[#allocation2 + $0x130] sm:$0xff] }
  0x38   :  { %2619 = vmatprep.subr.bf16.mxu0 %v3445_v35  ;;  %v3501_v13 = vpack.c.bf16 %v283_v12, %v280_v11  ;;  %v289_v17 = vld [vmem:[#allocation2 + $0x148] sm:$0xff]  ;;  %v292_v19 = vld [vmem:[#allocation2 + $0x160] sm:$0xff]  ;;  %v295_v20 = vld [vmem:[#allocation2 + $0x178] sm:$0xff] }
  0x39   :  { %2285 = vmatmul.mubr.msk.f32.vlgmr.msra.gmra.mrb[4].mxu1 %vm82_vm1, %v59_v30  ;;  %v3508_v18 = vpack.c.bf16 %v289_v17, %v286_v16  ;;  %v3514_v21 = vpack.c.bf16 %v295_v20, %v292_v19  ;;  %v62_v36 = vld [vmem:[%s3937_s4] sm:$0x7]  ;;  %v74_v20 = vsub.s32 2, %v65_v33 }
  0x3a   :  { %2636 = vmatpush3.bf16.msra.mxu1 %v3449_v40  ;;  %2319 = vmatprep.mubr.msk.f32.mxu1 %vm3330_vm2, %v3328_v0  ;;  %v67_v38 = vrot.slane %v62_v36, %v66_v34  ;;  %v71_v39 = vrot.slane %v62_v36, %v70_v37  ;;  %v3568_v19 = vld [vmem:[%s3938_s5] ss:$0 sm:$0xff] }
  0x3b   :  { %2621 = vmatpush1.bf16.msra.mxu0 %v3452_v41  ;;  %2637 = vmatprep.subr.bf16.mxu1 %v3329_v32 }
  0x3c   :  { %2623 = vmatprep.subr.bf16.mxu0 %v3455_v44 }
  0x3e   :  { %2639 = vmatpush3.bf16.msra.mxu1 %v3459_v49 }
  0x3f   :  { %2625 = vmatpush1.bf16.msra.mxu0 %v3464_v50  ;;  %2640 = vmatprep.subr.bf16.mxu1 %v3329_v32 }
  0x40   :  { %2627 = vmatprep.subr.bf16.mxu0 %v3468_v53 }
  0x42   :  { %2642 = vmatpush3.bf16.msra.mxu1 %v3471_v58 }
  0x43   :  { %2629 = vmatpush1.bf16.msra.mxu0 %v3474_v59  ;;  %2643 = vmatprep.subr.bf16.mxu1 %v3329_v32 }
  0x44   :  { %2631 = vmatprep.subr.bf16.mxu0 %v3478_v62 }
  0x46   :  { %2645 = vmatpush3.bf16.msra.mxu1 %v3481_v2 }
  0x47   :  { %2633 = vmatpush1.bf16.msra.mxu0 %v3484_v3  ;;  %2646 = vmatprep.subr.bf16.mxu1 %v3329_v32 }
  0x48   :  { %2659 = vmatprep.subr.bf16.mxu0 %v3403_v4 }
  0x4a   :  { %363 = vmatmul.mubr.f32.vlgmr.msra.gmra.mrb[0].mxu0 %v3495_v10  ;;  %2648 = vmatpush3.bf16.msra.mxu1 %v3489_v7 }
  0x4b   :  { %2649 = vmatprep.subr.bf16.mxu1 %v3329_v32  ;;  %2661 = vmatpush1.bf16.msra.mxu0 %v3405_v8 }
  0x4c   :  { %2663 = vmatprep.subr.bf16.mxu0 %v3407_v9  ;;  %574 = vmatprep.mubr.f32.mxu0 %v3328_v0 }
  0x4e   :  { %2651 = vmatpush3.bf16.msra.mxu1 %v3501_v13 }
  0x4f   :  { %2652 = vmatprep.subr.bf16.mxu1 %v3329_v32  ;;  %2665 = vmatpush1.bf16.msra.mxu0 %v3411_v14 }
  0x50   :  { %2667 = vmatprep.subr.bf16.mxu0 %v3414_v15 }
  0x52   :  { %2654 = vmatpush3.bf16.msra.mxu1 %v3508_v18 }
  0x53   :  { %2655 = vmatprep.subr.bf16.mxu1 %v3329_v32  ;;  %2669 = vmatpush1.bf16.msra.mxu0 %v3426_v24 }
  0x54   :  { %2671 = vmatprep.subr.bf16.mxu0 %v3430_v25 }
  0x56   :  { %2657 = vmatpush3.bf16.msra.mxu1 %v3514_v21 }
  0x57   :  { %2690 = vmatprep.subr.bf16.mxu1 %v3329_v32  ;;  %2673 = vmatpush1.bf16.msra.mxu0 %v3441_v31 }
  0x58   :  { %2675 = vmatprep.subr.bf16.mxu0 %v3445_v35 }
  0x59   :  { %2320 = vmatmul.mubr.f32.vlgmr.msra.gmra.mrb[6].mxu1 %v3495_v10 }
  0x5a   :  { %2692 = vmatpush3.bf16.msra.mxu1 %v3449_v40  ;;  %2354 = vmatprep.mubr.msk.f32.mxu1 %vm3330_vm2, %v3328_v0 }
  0x5b   :  { %2693 = vmatprep.subr.bf16.mxu1 %v3329_v32  ;;  %2677 = vmatpush1.bf16.msra.mxu0 %v3452_v41 }
  0x5c   :  { %2679 = vmatprep.subr.bf16.mxu0 %v3455_v44 }
  0x5e   :  { %2695 = vmatpush3.bf16.msra.mxu1 %v3459_v49 }
  0x5f   :  { %2696 = vmatprep.subr.bf16.mxu1 %v3329_v32  ;;  %2681 = vmatpush1.bf16.msra.mxu0 %v3464_v50 }
  0x60   :  { %2683 = vmatprep.subr.bf16.mxu0 %v3468_v53 }
  0x62   :  { %2698 = vmatpush3.bf16.msra.mxu1 %v3471_v58 }
  0x63   :  { %2699 = vmatprep.subr.bf16.mxu1 %v3329_v32  ;;  %2685 = vmatpush1.bf16.msra.mxu0 %v3474_v59 }
  0x64   :  { %2687 = vmatprep.subr.bf16.mxu0 %v3478_v62 }
  0x66   :  { %2701 = vmatpush3.bf16.msra.mxu1 %v3481_v2 }
  0x67   :  { %2702 = vmatprep.subr.bf16.mxu1 %v3329_v32  ;;  %2689 = vmatpush1.bf16.msra.mxu0 %v3484_v3 }
  0x68   :  { %2715 = vmatprep.subr.bf16.mxu0 %v3403_v4 }
  0x6a   :  { %2704 = vmatpush3.bf16.msra.mxu1 %v3489_v7 }
  0x6b   :  { %2705 = vmatprep.subr.bf16.mxu1 %v3329_v32 }
  0x6e   :  { %2707 = vmatpush3.bf16.msra.mxu1 %v3501_v13 }
  0x6f   :  { %2708 = vmatprep.subr.bf16.mxu1 %v3329_v32 }
  0x72   :  { %2710 = vmatpush3.bf16.msra.mxu1 %v3508_v18 }
  0x73   :  { %2711 = vmatprep.subr.bf16.mxu1 %v3329_v32 }
  0x76   :  { %2713 = vmatpush3.bf16.msra.mxu1 %v3514_v21 }
  0x77   :  { %2746 = vmatprep.subr.bf16.mxu1 %v3329_v32 }
 0x104   :  { %v162_v22 = vpop.f32.mrb[0].mxu1 }
 0x105   :  { %v164_v23 = vpop.f32.mrb[1].mxu1  ;;  %v3553_v42 = vadd.f32 %v162_v22, %v67_v38 }
 0x106   :  { %v3558_v51 = vadd.f32 %v164_v23, %v71_v39 }
 0x108   :  { %v168_v26 = vpop.f32.mrb[2].mxu1 }
 0x109   :  { %v170_v27 = vpop.f32.mrb[3].mxu1  ;;  %v3555_v45 = vadd.f32 %v168_v26, %v67_v38 }
 0x10a   :  { %v3561_v56 = vadd.f32 %v170_v27, %v71_v39  ;;  %v75_v27 = vrot.slane %v62_v36, %v74_v20 }
 0x10c   :  { %v2286_v29 = vpop.f32.mrb[4].mxu1 }
 0x10d   :  { %v239_v30 = vpop.f32.mrb[5].mxu1 }
 0x10e   :  { %v3571_v39 = vadd.f32 %v239_v30, %v75_v27 }
 0x11d   :  { %v364_v43 = vpop.f32.mrb[0].mxu0 }
 0x11e   :  { %v440_v46 = vrot.slane %v364_v43, 1  ;;  %v443_v47 = vadd.f32 %v364_v43, %v3553_v42  ;;  %v366_v48 = vpop.f32.mrb[1].mxu0 }
 0x11f   :  { %v458_v52 = vrot.slane %v366_v48, 1  ;;  %v461_v57 = vadd.f32 %v366_v48, %v3558_v51 }
 0x120   :  { %v444_v54 = vadd.f32 %v440_v46, %v3555_v45  ;;  %v2091_v55 = vmul.f32 -1.442695, %v443_v47  ;;  %v3573_v47 = vadd.f32 %v2286_v29, %v75_v27 }
 0x121   :  { %v462_v61 = vadd.f32 %v458_v52, %v3561_v56  ;;  %v2093_v63 = vmul.f32 -1.442695, %v461_v57 }
 0x122   :  { %3085 = vpow2.f32 %v2091_v55  ;;  %v2092_v60 = vmul.f32 -1.442695, %v444_v54  ;;  %v497_v55 = vrot.slane %v3495_v10, 1 }
 0x123   :  { %v2094_v1 = vmul.f32 -1.442695, %v462_v61 }
 0x124   :  { %3087 = vpow2.f32 %v2092_v60 }
 0x125   :  { %3089 = vpow2.f32 %v2093_v63 }
 0x126   :  { %3091 = vpow2.f32 %v2094_v1 }
 0x12c   :  { %v3086_v5 = vpop.eup %3085  ;;  %v435_v6 = vpop.f32.mrb[6].mxu1 }
 0x12d   :  { %v451_v11 = vadd.f32 1.0, %v3086_v5  ;;  %v2321_v12 = vpop.f32.mrb[7].mxu1  ;;  %v481_v23 = vadd.f32 %v3568_v19, %v435_v6 }
 0x12e   :  { %v3088_v16 = vpop.eup %3087 }
 0x12f   :  { %v452_v17 = vadd.f32 1.0, %v3088_v16  ;;  %3093 = vrcp.f32 %v451_v11  ;;  %v3090_v22 = vpop.eup %3089  ;;  %v483_v37 = vrot.slane %v481_v23, 1 }
 0x130   :  { %v3092_v26 = vpop.eup %3091  ;;  %v469_v28 = vadd.f32 1.0, %v3090_v22 }
 0x131   :  { %3095 = vrcp.f32 %v452_v17  ;;  %v470_v34 = vadd.f32 1.0, %v3092_v26 }
 0x132   :  { %3097 = vrcp.f32 %v469_v28 }
 0x133   :  { %3099 = vrcp.f32 %v470_v34 }
 0x139   :  { %v3094_v38 = vpop.eup %3093 }
 0x13a   :  { %v486_v43 = vmul.f32 %v3094_v38, %v481_v23 }
 0x13b   :  { %v3096_v46 = vpop.eup %3095 }
 0x13c   :  { %v487_v48 = vmul.f32 %v3096_v46, %v483_v37  ;;  %v488_v33 = vadd.f32 %v486_v43, %v3571_v39  ;;  %v3098_v36 = vpop.eup %3097 }
 0x13d   :  { %v3100_v54 = vpop.eup %3099  ;;  %v492_v57 = vsub.f32 1.0, %v3098_v36  ;;  %v500_v63 = vmul.f32 %v3098_v36, %v3495_v10 }
 0x13e   :  { %v489_v52 = vadd.f32 %v487_v48, %v3573_v47  ;;  %3101 = vtanh.f32 %v488_v33  ;;  %v493_v60 = vsub.f32 1.0, %v3100_v54  ;;  %v501_v5 = vmul.f32 %v3100_v54, %v497_v55 }
 0x140   :  { %3103 = vtanh.f32 %v489_v52 }
 0x148   :  { %v3102_v30 = vpop.eup %3101 }
 0x149   :  { %v494_v61 = vmul.f32 %v3102_v30, %v492_v57 }
 0x14a   :  { %v3104_v29 = vpop.eup %3103 }
 0x14b   :  { %v495_v1 = vmul.f32 %v3104_v29, %v493_v60  ;;  %v3579_v6 = vadd.f32 %v500_v63, %v494_v61 }
 0x14d   :  { %v3581_v11 = vadd.f32 %v501_v5, %v495_v1 }
 0x14f   :  { %v506_v12 = vrot.slane %v3581_v11, 7 }
 0x151   :  { %v508_v16 = vsel %vm507_vm3, %v506_v12, %v3579_v6 }
 0x152   :  { %575 = vmatmul.mubr.f32.vlgmr.msra.gmra.mrb[2].mxu0 %v508_v16  ;;  %2355 = vmatmul.mubr.f32.vlgmr.msra.gmra.mrb[8].mxu1 %v508_v16  ;;  %v702_v16 = vrot.slane %v3579_v6, 7 }
 0x153   :  { %2717 = vmatpush1.bf16.msra.mxu0 %v3405_v8  ;;  %2748 = vmatpush3.bf16.msra.mxu1 %v3449_v40 }
 0x154   :  { %2719 = vmatprep.subr.bf16.mxu0 %v3407_v9  ;;  %2749 = vmatprep.subr.bf16.mxu1 %v3329_v32 }
 0x155   :  { %778 = vmatprep.mubr.f32.mxu0 %v3328_v0  ;;  %2389 = vmatprep.mubr.msk.f32.mxu1 %vm3330_vm2, %v3328_v0 }
 0x157   :  { %2721 = vmatpush1.bf16.msra.mxu0 %v3411_v14  ;;  %2751 = vmatpush3.bf16.msra.mxu1 %v3459_v49 }
 0x158   :  { %2723 = vmatprep.subr.bf16.mxu0 %v3414_v15  ;;  %2752 = vmatprep.subr.bf16.mxu1 %v3329_v32 }
 0x15b   :  { %2725 = vmatpush1.bf16.msra.mxu0 %v3426_v24  ;;  %2754 = vmatpush3.bf16.msra.mxu1 %v3471_v58 }
 0x15c   :  { %2727 = vmatprep.subr.bf16.mxu0 %v3430_v25  ;;  %2755 = vmatprep.subr.bf16.mxu1 %v3329_v32 }
 0x15f   :  { %2729 = vmatpush1.bf16.msra.mxu0 %v3441_v31  ;;  %2757 = vmatpush3.bf16.msra.mxu1 %v3481_v2 }
 0x160   :  { %2731 = vmatprep.subr.bf16.mxu0 %v3445_v35  ;;  %2758 = vmatprep.subr.bf16.mxu1 %v3329_v32 }
 0x163   :  { %2733 = vmatpush1.bf16.msra.mxu0 %v3452_v41  ;;  %2760 = vmatpush3.bf16.msra.mxu1 %v3489_v7 }
 0x164   :  { %2735 = vmatprep.subr.bf16.mxu0 %v3455_v44  ;;  %2761 = vmatprep.subr.bf16.mxu1 %v3329_v32 }
 0x167   :  { %2737 = vmatpush1.bf16.msra.mxu0 %v3464_v50  ;;  %2763 = vmatpush3.bf16.msra.mxu1 %v3501_v13 }
 0x168   :  { %2739 = vmatprep.subr.bf16.mxu0 %v3468_v53  ;;  %2764 = vmatprep.subr.bf16.mxu1 %v3329_v32 }
 0x16b   :  { %2741 = vmatpush1.bf16.msra.mxu0 %v3474_v59  ;;  %2766 = vmatpush3.bf16.msra.mxu1 %v3508_v18 }
 0x16c   :  { %2743 = vmatprep.subr.bf16.mxu0 %v3478_v62  ;;  %2767 = vmatprep.subr.bf16.mxu1 %v3329_v32 }
 0x16f   :  { %2745 = vmatpush1.bf16.msra.mxu0 %v3484_v3  ;;  %2769 = vmatpush3.bf16.msra.mxu1 %v3514_v21 }
 0x170   :  { %2771 = vmatprep.subr.bf16.mxu0 %v3403_v4  ;;  %2802 = vmatprep.subr.bf16.mxu1 %v3329_v32 }
 0x225   :  { %v576_v10 = vpop.f32.mrb[2].mxu0  ;;  %v647_v17 = vpop.f32.mrb[8].mxu1 }
 0x226   :  { %v652_v20 = vrot.slane %v576_v10, 7  ;;  %v656_v22 = vadd.f32 %v576_v10, %v3555_v45  ;;  %v578_v23 = vpop.f32.mrb[3].mxu0  ;;  %v2356_v26 = vpop.f32.mrb[9].mxu1  ;;  %v687_v60 = vadd.f32 %v3568_v19, %v647_v17 }
 0x227   :  { %v670_v27 = vrot.slane %v578_v23, 7  ;;  %v674_v38 = vadd.f32 %v578_v23, %v3561_v56 }
 0x228   :  { %v655_v28 = vadd.f32 %v652_v20, %v3553_v42  ;;  %v2097_v34 = vmul.f32 -1.442695, %v656_v22  ;;  %v689_v29 = vrot.slane %v687_v60, 7 }
 0x229   :  { %v673_v37 = vadd.f32 %v670_v27, %v3558_v51  ;;  %v2099_v48 = vmul.f32 -1.442695, %v674_v38 }
 0x22a   :  { %v2096_v43 = vmul.f32 -1.442695, %v655_v28  ;;  %3105 = vpow2.f32 %v2097_v34 }
 0x22b   :  { %v2098_v46 = vmul.f32 -1.442695, %v673_v37 }
 0x22c   :  { %3107 = vpow2.f32 %v2096_v43 }
 0x22d   :  { %3109 = vpow2.f32 %v2098_v46 }
 0x22e   :  { %3111 = vpow2.f32 %v2099_v48 }
 0x234   :  { %v3106_v33 = vpop.eup %3105 }
 0x235   :  { %v664_v52 = vadd.f32 1.0, %v3106_v33 }
 0x236   :  { %v3108_v36 = vpop.eup %3107 }
 0x237   :  { %v3110_v54 = vpop.eup %3109  ;;  %v663_v55 = vadd.f32 1.0, %v3108_v36  ;;  %3113 = vrcp.f32 %v664_v52 }
 0x238   :  { %v681_v57 = vadd.f32 1.0, %v3110_v54  ;;  %v3112_v30 = vpop.eup %3111 }
 0x239   :  { %3115 = vrcp.f32 %v663_v55  ;;  %v682_v61 = vadd.f32 1.0, %v3112_v30 }
 0x23a   :  { %3117 = vrcp.f32 %v681_v57 }
 0x23b   :  { %3119 = vrcp.f32 %v682_v61 }
 0x241   :  { %v3114_v63 = vpop.eup %3113 }
 0x242   :  { %v693_v1 = vmul.f32 %v3114_v63, %v687_v60 }
 0x243   :  { %v3116_v5 = vpop.eup %3115 }
 0x244   :  { %v3118_v10 = vpop.eup %3117  ;;  %v692_v20 = vmul.f32 %v3116_v5, %v689_v29  ;;  %v695_v22 = vadd.f32 %v693_v1, %v3573_v47 }
 0x245   :  { %v705_v23 = vmul.f32 %v3118_v10, %v702_v16  ;;  %v3120_v27 = vpop.eup %3119  ;;  %v698_v34 = vsub.f32 1.0, %v3118_v10 }
 0x246   :  { %v694_v26 = vadd.f32 %v692_v20, %v3571_v39  ;;  %3121 = vtanh.f32 %v695_v22  ;;  %v699_v28 = vsub.f32 1.0, %v3120_v27  ;;  %v706_v38 = vmul.f32 %v3120_v27, %v506_v12 }
 0x248   :  { %3123 = vtanh.f32 %v694_v26 }
 0x250   :  { %v3122_v17 = vpop.eup %3121 }
 0x251   :  { %v701_v37 = vmul.f32 %v3122_v17, %v699_v28 }
 0x252   :  { %v3124_v43 = vpop.eup %3123 }
 0x253   :  { %v700_v46 = vmul.f32 %v3124_v43, %v698_v34  ;;  %v3633_v6 = vadd.f32 %v706_v38, %v701_v37 }
 0x255   :  { %v3635_v48 = vadd.f32 %v705_v23, %v700_v46 }
 0x257   :  { %v711_v33 = vrot.slane %v3635_v48, 1 }
 0x259   :  { %v712_v52 = vsel %vm507_vm3, %v3633_v6, %v711_v33 }
 0x25a   :  { %779 = vmatmul.mubr.f32.vlgmr.msra.gmra.mrb[4].mxu0 %v712_v52  ;;  %2390 = vmatmul.mubr.f32.vlgmr.msra.gmra.mrb[10].mxu1 %v712_v52 }
 0x25b   :  { %2773 = vmatpush1.bf16.msra.mxu0 %v3405_v8  ;;  %2804 = vmatpush3.bf16.msra.mxu1 %v3449_v40 }
 0x25c   :  { %2775 = vmatprep.subr.bf16.mxu0 %v3407_v9  ;;  %2805 = vmatprep.subr.bf16.mxu1 %v3329_v32 }
 0x25d   :  { %987 = vmatprep.mubr.f32.mxu0 %v3328_v0  ;;  %2424 = vmatprep.mubr.msk.f32.mxu1 %vm3330_vm2, %v3328_v0 }
 0x25f   :  { %2777 = vmatpush1.bf16.msra.mxu0 %v3411_v14  ;;  %2807 = vmatpush3.bf16.msra.mxu1 %v3459_v49 }
 0x260   :  { %2779 = vmatprep.subr.bf16.mxu0 %v3414_v15  ;;  %2808 = vmatprep.subr.bf16.mxu1 %v3329_v32 }
 0x263   :  { %2781 = vmatpush1.bf16.msra.mxu0 %v3426_v24  ;;  %2810 = vmatpush3.bf16.msra.mxu1 %v3471_v58 }
 0x264   :  { %2783 = vmatprep.subr.bf16.mxu0 %v3430_v25  ;;  %2811 = vmatprep.subr.bf16.mxu1 %v3329_v32 }
 0x267   :  { %2785 = vmatpush1.bf16.msra.mxu0 %v3441_v31  ;;  %2813 = vmatpush3.bf16.msra.mxu1 %v3481_v2 }
 0x268   :  { %2787 = vmatprep.subr.bf16.mxu0 %v3445_v35  ;;  %2814 = vmatprep.subr.bf16.mxu1 %v3329_v32 }
 0x26b   :  { %2789 = vmatpush1.bf16.msra.mxu0 %v3452_v41  ;;  %2816 = vmatpush3.bf16.msra.mxu1 %v3489_v7 }
 0x26c   :  { %2791 = vmatprep.subr.bf16.mxu0 %v3455_v44  ;;  %2817 = vmatprep.subr.bf16.mxu1 %v3329_v32 }
 0x26f   :  { %2793 = vmatpush1.bf16.msra.mxu0 %v3464_v50  ;;  %2819 = vmatpush3.bf16.msra.mxu1 %v3501_v13 }
 0x270   :  { %2795 = vmatprep.subr.bf16.mxu0 %v3468_v53  ;;  %2820 = vmatprep.subr.bf16.mxu1 %v3329_v32 }
 0x273   :  { %2797 = vmatpush1.bf16.msra.mxu0 %v3474_v59  ;;  %2822 = vmatpush3.bf16.msra.mxu1 %v3508_v18 }
 0x274   :  { %2799 = vmatprep.subr.bf16.mxu0 %v3478_v62  ;;  %2823 = vmatprep.subr.bf16.mxu1 %v3329_v32 }
 0x277   :  { %2801 = vmatpush1.bf16.msra.mxu0 %v3484_v3  ;;  %2825 = vmatpush3.bf16.msra.mxu1 %v3514_v21 }
 0x278   :  { %2827 = vmatprep.subr.bf16.mxu0 %v3403_v4  ;;  %2858 = vmatprep.subr.bf16.mxu1 %v3329_v32 }
 0x32d   :  { %v780_v11 = vpop.f32.mrb[4].mxu0  ;;  %v851_v12 = vpop.f32.mrb[10].mxu1 }
 0x32e   :  { %v856_v36 = vrot.slane %v780_v11, 6  ;;  %v857_v54 = vrot.slane %v780_v11, 7  ;;  %v782_v55 = vpop.f32.mrb[5].mxu0  ;;  %v2391_v57 = vpop.f32.mrb[11].mxu1  ;;  %v893_v38 = vadd.f32 %v3568_v19, %v851_v12  ;;  %v909_v11 = vrot.slane %v3635_v48, 7 }
 0x32f   :  { %v875_v30 = vrot.slane %v782_v55, 6  ;;  %v876_v60 = vrot.slane %v782_v55, 7  ;;  %v910_v55 = vrot.slane %v3633_v6, 7 }
 0x330   :  { %v860_v61 = vadd.f32 %v856_v36, %v3553_v42  ;;  %v861_v63 = vadd.f32 %v857_v54, %v3555_v45  ;;  %v895_v43 = vrot.slane %v893_v38, 6  ;;  %v896_v33 = vrot.slane %v893_v38, 7 }
 0x331   :  { %v879_v29 = vadd.f32 %v875_v30, %v3558_v51  ;;  %v880_v1 = vadd.f32 %v876_v60, %v3561_v56 }
 0x332   :  { %v2100_v5 = vmul.f32 -1.442695, %v860_v61  ;;  %v2101_v16 = vmul.f32 -1.442695, %v861_v63 }
 0x333   :  { %v2102_v10 = vmul.f32 -1.442695, %v879_v29  ;;  %v2103_v20 = vmul.f32 -1.442695, %v880_v1 }
 0x334   :  { %3125 = vpow2.f32 %v2100_v5 }
 0x335   :  { %3127 = vpow2.f32 %v2101_v16 }
 0x336   :  { %3129 = vpow2.f32 %v2102_v10 }
 0x337   :  { %3131 = vpow2.f32 %v2103_v20 }
 0x33e   :  { %v3126_v22 = vpop.eup %3125 }
 0x33f   :  { %v3128_v23 = vpop.eup %3127  ;;  %v868_v26 = vadd.f32 1.0, %v3126_v22 }
 0x340   :  { %v3130_v27 = vpop.eup %3129  ;;  %v869_v28 = vadd.f32 1.0, %v3128_v23 }
 0x341   :  { %v3132_v17 = vpop.eup %3131  ;;  %3133 = vrcp.f32 %v868_v26  ;;  %v887_v34 = vadd.f32 1.0, %v3130_v27 }
 0x342   :  { %3135 = vrcp.f32 %v869_v28  ;;  %v888_v37 = vadd.f32 1.0, %v3132_v17 }
 0x343   :  { %3137 = vrcp.f32 %v887_v34 }
 0x344   :  { %3139 = vrcp.f32 %v888_v37 }
 0x34b   :  { %v3134_v46 = vpop.eup %3133 }
 0x34c   :  { %v3136_v52 = vpop.eup %3135  ;;  %v899_v36 = vmul.f32 %v3134_v46, %v895_v43 }
 0x34d   :  { %v3138_v54 = vpop.eup %3137  ;;  %v900_v57 = vmul.f32 %v3136_v52, %v896_v33 }
 0x34e   :  { %v3140_v30 = vpop.eup %3139  ;;  %v901_v60 = vadd.f32 %v899_v36, %v3571_v39  ;;  %v913_v61 = vmul.f32 %v3138_v54, %v909_v11  ;;  %v905_v12 = vsub.f32 1.0, %v3138_v54 }
 0x34f   :  { %v902_v63 = vadd.f32 %v900_v57, %v3573_v47  ;;  %v914_v29 = vmul.f32 %v3140_v30, %v910_v55  ;;  %v906_v5 = vsub.f32 1.0, %v3140_v30 }
 0x350   :  { %3141 = vtanh.f32 %v901_v60 }
 0x351   :  { %3143 = vtanh.f32 %v902_v63 }
 0x35a   :  { %v3142_v1 = vpop.eup %3141 }
 0x35b   :  { %v3144_v16 = vpop.eup %3143  ;;  %v907_v10 = vmul.f32 %v3142_v1, %v905_v12 }
 0x35c   :  { %v908_v48 = vmul.f32 %v3144_v16, %v906_v5 }
 0x35d   :  { %v3684_v20 = vadd.f32 %v913_v61, %v907_v10 }
 0x35e   :  { %v3686_v22 = vadd.f32 %v914_v29, %v908_v48 }
 0x35f   :  { %v919_v6 = vrot.slane %v3684_v20, 2 }
 0x360   :  { %v920_v23 = vrot.slane %v3686_v22, 1 }
 0x362   :  { %v921_v26 = vsel %vm507_vm3, %v920_v23, %v919_v6 }
 0x363   :  { %988 = vmatmul.mubr.f32.vlgmr.msra.gmra.mrb[6].mxu0 %v921_v26  ;;  %2425 = vmatmul.mubr.f32.vlgmr.msra.gmra.mrb[12].mxu1 %v921_v26 }
 0x364   :  { %2829 = vmatpush1.bf16.msra.mxu0 %v3405_v8  ;;  %2860 = vmatpush3.bf16.msra.mxu1 %v3449_v40 }
 0x365   :  { %2831 = vmatprep.subr.bf16.mxu0 %v3407_v9  ;;  %2861 = vmatprep.subr.bf16.mxu1 %v3329_v32 }
 0x366   :  { %1196 = vmatprep.mubr.f32.mxu0 %v3328_v0  ;;  %2459 = vmatprep.mubr.msk.f32.mxu1 %vm3330_vm2, %v3328_v0 }
 0x368   :  { %2833 = vmatpush1.bf16.msra.mxu0 %v3411_v14  ;;  %2863 = vmatpush3.bf16.msra.mxu1 %v3459_v49 }
 0x369   :  { %2835 = vmatprep.subr.bf16.mxu0 %v3414_v15  ;;  %2864 = vmatprep.subr.bf16.mxu1 %v3329_v32 }
 0x36c   :  { %2837 = vmatpush1.bf16.msra.mxu0 %v3426_v24  ;;  %2866 = vmatpush3.bf16.msra.mxu1 %v3471_v58 }
 0x36d   :  { %2839 = vmatprep.subr.bf16.mxu0 %v3430_v25  ;;  %2867 = vmatprep.subr.bf16.mxu1 %v3329_v32 }
 0x370   :  { %2841 = vmatpush1.bf16.msra.mxu0 %v3441_v31  ;;  %2869 = vmatpush3.bf16.msra.mxu1 %v3481_v2 }
 0x371   :  { %2843 = vmatprep.subr.bf16.mxu0 %v3445_v35  ;;  %2870 = vmatprep.subr.bf16.mxu1 %v3329_v32 }
 0x374   :  { %2845 = vmatpush1.bf16.msra.mxu0 %v3452_v41  ;;  %2872 = vmatpush3.bf16.msra.mxu1 %v3489_v7 }
 0x375   :  { %2847 = vmatprep.subr.bf16.mxu0 %v3455_v44  ;;  %2873 = vmatprep.subr.bf16.mxu1 %v3329_v32 }
 0x378   :  { %2849 = vmatpush1.bf16.msra.mxu0 %v3464_v50  ;;  %2875 = vmatpush3.bf16.msra.mxu1 %v3501_v13 }
 0x379   :  { %2851 = vmatprep.subr.bf16.mxu0 %v3468_v53  ;;  %2876 = vmatprep.subr.bf16.mxu1 %v3329_v32 }
 0x37c   :  { %2853 = vmatpush1.bf16.msra.mxu0 %v3474_v59  ;;  %2878 = vmatpush3.bf16.msra.mxu1 %v3508_v18 }
 0x37d   :  { %2855 = vmatprep.subr.bf16.mxu0 %v3478_v62  ;;  %2879 = vmatprep.subr.bf16.mxu1 %v3329_v32 }
 0x380   :  { %2857 = vmatpush1.bf16.msra.mxu0 %v3484_v3  ;;  %2881 = vmatpush3.bf16.msra.mxu1 %v3514_v21 }
 0x381   :  { %2883 = vmatprep.subr.bf16.mxu0 %v3403_v4  ;;  %2914 = vmatprep.subr.bf16.mxu1 %v3329_v32 }
 0x436   :  { %v989_v27 = vpop.f32.mrb[6].mxu0  ;;  %v1060_v28 = vpop.f32.mrb[12].mxu1 }
 0x437   :  { %v1065_v17 = vrot.slane %v989_v27, 5  ;;  %v1066_v34 = vrot.slane %v989_v27, 6  ;;  %v991_v37 = vpop.f32.mrb[7].mxu0  ;;  %v2426_v38 = vpop.f32.mrb[13].mxu1  ;;  %v1102_v10 = vadd.f32 %v3568_v19, %v1060_v28  ;;  %v1118_v27 = vrot.slane %v3684_v20, 7 }
 0x438   :  { %v1084_v43 = vrot.slane %v991_v37, 5  ;;  %v1085_v46 = vrot.slane %v991_v37, 6  ;;  %v1119_v37 = vrot.slane %v3686_v22, 7 }
 0x439   :  { %v1069_v33 = vadd.f32 %v1065_v17, %v3553_v42  ;;  %v1070_v52 = vadd.f32 %v1066_v34, %v3555_v45  ;;  %v1104_v48 = vrot.slane %v1102_v10, 5  ;;  %v1105_v23 = vrot.slane %v1102_v10, 6 }
 0x43a   :  { %v1088_v11 = vadd.f32 %v1084_v43, %v3558_v51  ;;  %v1089_v36 = vadd.f32 %v1085_v46, %v3561_v56 }
 0x43b   :  { %v2104_v54 = vmul.f32 -1.442695, %v1069_v33  ;;  %v2105_v55 = vmul.f32 -1.442695, %v1070_v52 }
 0x43c   :  { %v2106_v57 = vmul.f32 -1.442695, %v1088_v11  ;;  %v2107_v30 = vmul.f32 -1.442695, %v1089_v36 }
 0x43d   :  { %3145 = vpow2.f32 %v2104_v54 }
 0x43e   :  { %3147 = vpow2.f32 %v2105_v55 }
 0x43f   :  { %3149 = vpow2.f32 %v2106_v57 }
 0x440   :  { %3151 = vpow2.f32 %v2107_v30 }
 0x447   :  { %v3146_v60 = vpop.eup %3145 }
 0x448   :  { %v3148_v61 = vpop.eup %3147  ;;  %v1077_v63 = vadd.f32 1.0, %v3146_v60 }
 0x449   :  { %v3150_v29 = vpop.eup %3149  ;;  %v1078_v12 = vadd.f32 1.0, %v3148_v61 }
 0x44a   :  { %v3152_v1 = vpop.eup %3151  ;;  %3153 = vrcp.f32 %v1077_v63  ;;  %v1096_v5 = vadd.f32 1.0, %v3150_v29 }
 0x44b   :  { %3155 = vrcp.f32 %v1078_v12  ;;  %v1097_v16 = vadd.f32 1.0, %v3152_v1 }
 0x44c   :  { %3157 = vrcp.f32 %v1096_v5 }
 0x44d   :  { %3159 = vrcp.f32 %v1097_v16 }
 0x454   :  { %v3154_v6 = vpop.eup %3153 }
 0x455   :  { %v3156_v26 = vpop.eup %3155  ;;  %v1108_v17 = vmul.f32 %v3154_v6, %v1104_v48 }
 0x456   :  { %v3158_v34 = vpop.eup %3157  ;;  %v1109_v38 = vmul.f32 %v3156_v26, %v1105_v23 }
 0x457   :  { %v3160_v43 = vpop.eup %3159  ;;  %v1110_v46 = vadd.f32 %v1108_v17, %v3571_v39  ;;  %v1122_v33 = vmul.f32 %v3158_v34, %v1118_v27  ;;  %v1114_v28 = vsub.f32 1.0, %v3158_v34 }
 0x458   :  { %v1111_v52 = vadd.f32 %v1109_v38, %v3573_v47  ;;  %v1123_v11 = vmul.f32 %v3160_v43, %v1119_v37  ;;  %v1115_v54 = vsub.f32 1.0, %v3160_v43 }
 0x459   :  { %3161 = vtanh.f32 %v1110_v46 }
 0x45a   :  { %3163 = vtanh.f32 %v1111_v52 }
 0x463   :  { %v3162_v36 = vpop.eup %3161 }
 0x464   :  { %v3164_v55 = vpop.eup %3163  ;;  %v1116_v57 = vmul.f32 %v3162_v36, %v1114_v28 }
 0x465   :  { %v1117_v20 = vmul.f32 %v3164_v55, %v1115_v54 }
 0x466   :  { %v3735_v30 = vadd.f32 %v1122_v33, %v1116_v57 }
 0x467   :  { %v3737_v60 = vadd.f32 %v1123_v11, %v1117_v20 }
 0x468   :  { %v1128_v22 = vrot.slane %v3735_v30, 3 }
 0x469   :  { %v1129_v61 = vrot.slane %v3737_v60, 2 }
 0x46b   :  { %v1130_v63 = vsel %vm507_vm3, %v1129_v61, %v1128_v22 }
 0x46c   :  { %1197 = vmatmul.mubr.f32.vlgmr.msra.gmra.mrb[8].mxu0 %v1130_v63  ;;  %2460 = vmatmul.mubr.f32.vlgmr.msra.gmra.mrb[14].mxu1 %v1130_v63 }
 0x46d   :  { %2885 = vmatpush1.bf16.msra.mxu0 %v3405_v8  ;;  %2916 = vmatpush3.bf16.msra.mxu1 %v3449_v40 }
 0x46e   :  { %2887 = vmatprep.subr.bf16.mxu0 %v3407_v9  ;;  %2917 = vmatprep.subr.bf16.mxu1 %v3329_v32 }
 0x46f   :  { %1405 = vmatprep.mubr.f32.mxu0 %v3328_v0  ;;  %2494 = vmatprep.mubr.msk.f32.mxu1 %vm3330_vm2, %v3328_v0 }
 0x471   :  { %2889 = vmatpush1.bf16.msra.mxu0 %v3411_v14  ;;  %2919 = vmatpush3.bf16.msra.mxu1 %v3459_v49 }
 0x472   :  { %2891 = vmatprep.subr.bf16.mxu0 %v3414_v15  ;;  %2920 = vmatprep.subr.bf16.mxu1 %v3329_v32 }
 0x475   :  { %2893 = vmatpush1.bf16.msra.mxu0 %v3426_v24  ;;  %2922 = vmatpush3.bf16.msra.mxu1 %v3471_v58 }
 0x476   :  { %2895 = vmatprep.subr.bf16.mxu0 %v3430_v25  ;;  %2923 = vmatprep.subr.bf16.mxu1 %v3329_v32 }
 0x479   :  { %2897 = vmatpush1.bf16.msra.mxu0 %v3441_v31  ;;  %2925 = vmatpush3.bf16.msra.mxu1 %v3481_v2 }
 0x47a   :  { %2899 = vmatprep.subr.bf16.mxu0 %v3445_v35  ;;  %2926 = vmatprep.subr.bf16.mxu1 %v3329_v32 }
 0x47d   :  { %2901 = vmatpush1.bf16.msra.mxu0 %v3452_v41  ;;  %2928 = vmatpush3.bf16.msra.mxu1 %v3489_v7 }
 0x47e   :  { %2903 = vmatprep.subr.bf16.mxu0 %v3455_v44  ;;  %2929 = vmatprep.subr.bf16.mxu1 %v3329_v32 }
 0x481   :  { %2905 = vmatpush1.bf16.msra.mxu0 %v3464_v50  ;;  %2931 = vmatpush3.bf16.msra.mxu1 %v3501_v13 }
 0x482   :  { %2907 = vmatprep.subr.bf16.mxu0 %v3468_v53  ;;  %2932 = vmatprep.subr.bf16.mxu1 %v3329_v32 }
 0x485   :  { %2909 = vmatpush1.bf16.msra.mxu0 %v3474_v59  ;;  %2934 = vmatpush3.bf16.msra.mxu1 %v3508_v18 }
 0x486   :  { %2911 = vmatprep.subr.bf16.mxu0 %v3478_v62  ;;  %2935 = vmatprep.subr.bf16.mxu1 %v3329_v32 }
 0x489   :  { %2913 = vmatpush1.bf16.msra.mxu0 %v3484_v3  ;;  %2937 = vmatpush3.bf16.msra.mxu1 %v3514_v21 }
 0x48a   :  { %2939 = vmatprep.subr.bf16.mxu0 %v3403_v4  ;;  %2970 = vmatprep.subr.bf16.mxu1 %v3329_v32 }
 0x53f   :  { %v1198_v29 = vpop.f32.mrb[8].mxu0  ;;  %v1269_v12 = vpop.f32.mrb[14].mxu1 }
 0x540   :  { %v1274_v1 = vrot.slane %v1198_v29, 4  ;;  %v1275_v5 = vrot.slane %v1198_v29, 5  ;;  %v1200_v16 = vpop.f32.mrb[9].mxu0  ;;  %v2461_v10 = vpop.f32.mrb[15].mxu1  ;;  %v1311_v57 = vadd.f32 %v3568_v19, %v1269_v12  ;;  %v1327_v29 = vrot.slane %v3735_v30, 7 }
 0x541   :  { %v1293_v48 = vrot.slane %v1200_v16, 4  ;;  %v1294_v6 = vrot.slane %v1200_v16, 5  ;;  %v1328_v16 = vrot.slane %v3737_v60, 7 }
 0x542   :  { %v1278_v23 = vadd.f32 %v1274_v1, %v3553_v42  ;;  %v1279_v26 = vadd.f32 %v1275_v5, %v3555_v45  ;;  %v1313_v20 = vrot.slane %v1311_v57, 4  ;;  %v1314_v61 = vrot.slane %v1311_v57, 5 }
 0x543   :  { %v1297_v27 = vadd.f32 %v1293_v48, %v3558_v51  ;;  %v1298_v17 = vadd.f32 %v1294_v6, %v3561_v56 }
 0x544   :  { %v2108_v34 = vmul.f32 -1.442695, %v1278_v23  ;;  %v2109_v37 = vmul.f32 -1.442695, %v1279_v26 }
 0x545   :  { %v2110_v38 = vmul.f32 -1.442695, %v1297_v27  ;;  %v2111_v43 = vmul.f32 -1.442695, %v1298_v17 }
 0x546   :  { %3165 = vpow2.f32 %v2108_v34 }
 0x547   :  { %3167 = vpow2.f32 %v2109_v37 }
 0x548   :  { %3169 = vpow2.f32 %v2110_v38 }
 0x549   :  { %3171 = vpow2.f32 %v2111_v43 }
 0x550   :  { %v3166_v46 = vpop.eup %3165 }
 0x551   :  { %v3168_v33 = vpop.eup %3167  ;;  %v1286_v52 = vadd.f32 1.0, %v3166_v46 }
 0x552   :  { %v3170_v11 = vpop.eup %3169  ;;  %v1287_v28 = vadd.f32 1.0, %v3168_v33 }
 0x553   :  { %v3172_v36 = vpop.eup %3171  ;;  %3173 = vrcp.f32 %v1286_v52  ;;  %v1305_v54 = vadd.f32 1.0, %v3170_v11 }
 0x554   :  { %3175 = vrcp.f32 %v1287_v28  ;;  %v1306_v55 = vadd.f32 1.0, %v3172_v36 }
 0x555   :  { %3177 = vrcp.f32 %v1305_v54 }
 0x556   :  { %3179 = vrcp.f32 %v1306_v55 }
 0x55d   :  { %v3174_v22 = vpop.eup %3173 }
 0x55e   :  { %v3176_v63 = vpop.eup %3175  ;;  %v1317_v1 = vmul.f32 %v3174_v22, %v1313_v20 }
 0x55f   :  { %v3178_v5 = vpop.eup %3177  ;;  %v1318_v10 = vmul.f32 %v3176_v63, %v1314_v61 }
 0x560   :  { %v3180_v48 = vpop.eup %3179  ;;  %v1319_v6 = vadd.f32 %v1317_v1, %v3571_v39  ;;  %v1331_v23 = vmul.f32 %v3178_v5, %v1327_v29  ;;  %v1323_v12 = vsub.f32 1.0, %v3178_v5 }
 0x561   :  { %v1320_v26 = vadd.f32 %v1318_v10, %v3573_v47  ;;  %v1332_v27 = vmul.f32 %v3180_v48, %v1328_v16  ;;  %v1324_v34 = vsub.f32 1.0, %v3180_v48 }
 0x562   :  { %3181 = vtanh.f32 %v1319_v6 }
 0x563   :  { %3183 = vtanh.f32 %v1320_v26 }
 0x56c   :  { %v3182_v17 = vpop.eup %3181 }
 0x56d   :  { %v3184_v37 = vpop.eup %3183  ;;  %v1325_v38 = vmul.f32 %v3182_v17, %v1323_v12 }
 0x56e   :  { %v1326_v30 = vmul.f32 %v3184_v37, %v1324_v34 }
 0x56f   :  { %v3786_v43 = vadd.f32 %v1331_v23, %v1325_v38 }
 0x570   :  { %v3788_v46 = vadd.f32 %v1332_v27, %v1326_v30 }
 0x571   :  { %v1337_v60 = vrot.slane %v3786_v43, 4 }
 0x572   :  { %v1338_v33 = vrot.slane %v3788_v46, 3 }
 0x574   :  { %v1339_v52 = vsel %vm507_vm3, %v1338_v33, %v1337_v60 }
 0x575   :  { %1406 = vmatmul.mubr.f32.vlgmr.msra.gmra.mrb[10].mxu0 %v1339_v52  ;;  %2495 = vmatmul.mubr.f32.vlgmr.msra.gmra.mrb[16].mxu1 %v1339_v52  ;;  %v1536_v52 = vrot.slane %v3786_v43, 7 }
 0x576   :  { %2941 = vmatpush1.bf16.msra.mxu0 %v3405_v8  ;;  %2972 = vmatpush3.bf16.msra.mxu1 %v3449_v40 }
 0x577   :  { %2943 = vmatprep.subr.bf16.mxu0 %v3407_v9  ;;  %2973 = vmatprep.subr.bf16.mxu1 %v3329_v32 }
 0x578   :  { %1614 = vmatprep.mubr.f32.mxu0 %v3328_v0  ;;  %2529 = vmatprep.mubr.msk.f32.mxu1 %vm3330_vm2, %v3328_v0 }
 0x57a   :  { %2945 = vmatpush1.bf16.msra.mxu0 %v3411_v14  ;;  %2975 = vmatpush3.bf16.msra.mxu1 %v3459_v49 }
 0x57b   :  { %2947 = vmatprep.subr.bf16.mxu0 %v3414_v15  ;;  %2976 = vmatprep.subr.bf16.mxu1 %v3329_v32 }
 0x57e   :  { %2949 = vmatpush1.bf16.msra.mxu0 %v3426_v24  ;;  %2978 = vmatpush3.bf16.msra.mxu1 %v3471_v58 }
 0x57f   :  { %2951 = vmatprep.subr.bf16.mxu0 %v3430_v25  ;;  %2979 = vmatprep.subr.bf16.mxu1 %v3329_v32 }
 0x582   :  { %2953 = vmatpush1.bf16.msra.mxu0 %v3441_v31  ;;  %2981 = vmatpush3.bf16.msra.mxu1 %v3481_v2 }
 0x583   :  { %2955 = vmatprep.subr.bf16.mxu0 %v3445_v35  ;;  %2982 = vmatprep.subr.bf16.mxu1 %v3329_v32 }
 0x586   :  { %2957 = vmatpush1.bf16.msra.mxu0 %v3452_v41  ;;  %2984 = vmatpush3.bf16.msra.mxu1 %v3489_v7 }
 0x587   :  { %2959 = vmatprep.subr.bf16.mxu0 %v3455_v44  ;;  %2985 = vmatprep.subr.bf16.mxu1 %v3329_v32 }
 0x58a   :  { %2961 = vmatpush1.bf16.msra.mxu0 %v3464_v50  ;;  %2987 = vmatpush3.bf16.msra.mxu1 %v3501_v13 }
 0x58b   :  { %2963 = vmatprep.subr.bf16.mxu0 %v3468_v53  ;;  %2988 = vmatprep.subr.bf16.mxu1 %v3329_v32 }
 0x58e   :  { %2965 = vmatpush1.bf16.msra.mxu0 %v3474_v59  ;;  %2990 = vmatpush3.bf16.msra.mxu1 %v3508_v18 }
 0x58f   :  { %2967 = vmatprep.subr.bf16.mxu0 %v3478_v62  ;;  %2991 = vmatprep.subr.bf16.mxu1 %v3329_v32 }
 0x592   :  { %2969 = vmatpush1.bf16.msra.mxu0 %v3484_v3  ;;  %2993 = vmatpush3.bf16.msra.mxu1 %v3514_v21 }
 0x593   :  { %2995 = vmatprep.subr.bf16.mxu0 %v3403_v4  ;;  %3026 = vmatprep.subr.bf16.mxu1 %v3329_v32 }
 0x648   :  { %v1407_v11 = vpop.f32.mrb[10].mxu0  ;;  %v1478_v28 = vpop.f32.mrb[16].mxu1 }
 0x649   :  { %v1483_v36 = vrot.slane %v1407_v11, 3  ;;  %v1484_v54 = vrot.slane %v1407_v11, 4  ;;  %v1409_v55 = vpop.f32.mrb[11].mxu0  ;;  %v2496_v57 = vpop.f32.mrb[17].mxu1  ;;  %v1520_v37 = vadd.f32 %v3568_v19, %v1478_v28 }
 0x64a   :  { %v1502_v20 = vrot.slane %v1409_v55, 3  ;;  %v1503_v22 = vrot.slane %v1409_v55, 4 }
 0x64b   :  { %v1487_v61 = vadd.f32 %v1483_v36, %v3553_v42  ;;  %v1488_v63 = vadd.f32 %v1484_v54, %v3555_v45  ;;  %v1522_v38 = vrot.slane %v1520_v37, 3  ;;  %v1523_v60 = vrot.slane %v1520_v37, 4 }
 0x64c   :  { %v1506_v29 = vadd.f32 %v1502_v20, %v3558_v51  ;;  %v1507_v1 = vadd.f32 %v1503_v22, %v3561_v56  ;;  %v1537_v54 = vrot.slane %v3788_v46, 7 }
 0x64d   :  { %v2112_v5 = vmul.f32 -1.442695, %v1487_v61  ;;  %v2113_v4 = vmul.f32 -1.442695, %v1488_v63 }
 0x64e   :  { %v2114_v16 = vmul.f32 -1.442695, %v1506_v29  ;;  %v2115_v10 = vmul.f32 -1.442695, %v1507_v1 }
 0x64f   :  { %3185 = vpow2.f32 %v2112_v5 }
 0x650   :  { %3187 = vpow2.f32 %v2113_v4 }
 0x651   :  { %3189 = vpow2.f32 %v2114_v16 }
 0x652   :  { %3191 = vpow2.f32 %v2115_v10 }
 0x659   :  { %v3186_v48 = vpop.eup %3185 }
 0x65a   :  { %v3188_v6 = vpop.eup %3187  ;;  %v1495_v23 = vadd.f32 1.0, %v3186_v48 }
 0x65b   :  { %v3190_v26 = vpop.eup %3189  ;;  %v1496_v27 = vadd.f32 1.0, %v3188_v6 }
 0x65c   :  { %v3192_v12 = vpop.eup %3191  ;;  %3193 = vrcp.f32 %v1495_v23  ;;  %v1514_v17 = vadd.f32 1.0, %v3190_v26  ;;  %v3885_v23 = vld [vmem:[%s3938_s5] ss:$0 sm:$0xff] }
 0x65d   :  { %3195 = vrcp.f32 %v1496_v27  ;;  %v1515_v34 = vadd.f32 1.0, %v3192_v12 }
 0x65e   :  { %3197 = vrcp.f32 %v1514_v17 }
 0x65f   :  { %3199 = vrcp.f32 %v1515_v34 }
 0x666   :  { %v3194_v30 = vpop.eup %3193 }
 0x667   :  { %v3196_v33 = vpop.eup %3195  ;;  %v1526_v11 = vmul.f32 %v3194_v30, %v1522_v38 }
 0x668   :  { %v3198_v36 = vpop.eup %3197  ;;  %v1527_v55 = vmul.f32 %v3196_v33, %v1523_v60 }
 0x669   :  { %v3200_v57 = vpop.eup %3199  ;;  %v1528_v20 = vadd.f32 %v1526_v11, %v3571_v39  ;;  %v1540_v22 = vmul.f32 %v3198_v36, %v1536_v52  ;;  %v1532_v19 = vsub.f32 1.0, %v3198_v36 }
 0x66a   :  { %v1529_v61 = vadd.f32 %v1527_v55, %v3573_v47  ;;  %v1541_v63 = vmul.f32 %v3200_v57, %v1537_v54  ;;  %v1533_v29 = vsub.f32 1.0, %v3200_v57 }
 0x66b   :  { %3201 = vtanh.f32 %v1528_v20 }
 0x66c   :  { %3203 = vtanh.f32 %v1529_v61 }
 0x675   :  { %v3202_v28 = vpop.eup %3201 }
 0x676   :  { %v3204_v1 = vpop.eup %3203  ;;  %v1534_v5 = vmul.f32 %v3202_v28, %v1532_v19 }
 0x677   :  { %v1535_v43 = vmul.f32 %v3204_v1, %v1533_v29 }
 0x678   :  { %v3837_v4 = vadd.f32 %v1540_v22, %v1534_v5 }
 0x679   :  { %v3839_v16 = vadd.f32 %v1541_v63, %v1535_v43 }
 0x67a   :  { %v1546_v46 = vrot.slane %v3837_v4, 5  ;;  %v1745_v37 = vrot.slane %v3837_v4, 7  ;;  %v1962_v4 = vld [vmem:[#allocation5] sm:$0xff] }
 0x67b   :  { %v1547_v10 = vrot.slane %v3839_v16, 4  ;;  %v1746_v60 = vrot.slane %v3839_v16, 7  ;;  %v1963_v16 = vld [vmem:[#allocation5 + $0x8] sm:$0xff] }
 0x67d   :  { %v1548_v48 = vsel %vm507_vm3, %v1547_v10, %v1546_v46  ;;  %v3051_v46 = vpack.c.bf16 %v1963_v16, %v1962_v4  ;;  %v1964_v10 = vld [vmem:[#allocation5 + $0x10] sm:$0xff] }
 0x67e   :  { %1615 = vmatmul.mubr.f32.vlgmr.msra.gmra.mrb[12].mxu0 %v1548_v48  ;;  %2530 = vmatmul.mubr.f32.vlgmr.msra.gmra.mrb[18].mxu1 %v1548_v48  ;;  %v1965_v48 = vld [vmem:[#allocation5 + $0x18] sm:$0xff] }
 0x67f   :  { %2997 = vmatpush1.bf16.msra.mxu0 %v3405_v8  ;;  %3028 = vmatpush3.bf16.msra.mxu1 %v3449_v40 }
 0x680   :  { %2999 = vmatprep.subr.bf16.mxu0 %v3407_v9  ;;  %3029 = vmatprep.subr.bf16.mxu1 %v3329_v32 }
 0x681   :  { %1823 = vmatprep.mubr.f32.mxu0 %v3328_v0  ;;  %2564 = vmatprep.mubr.msk.f32.mxu1 %vm3330_vm2, %v3328_v0 }
 0x683   :  { %3001 = vmatpush1.bf16.msra.mxu0 %v3411_v14  ;;  %3031 = vmatpush3.bf16.msra.mxu1 %v3459_v49 }
 0x684   :  { %3003 = vmatprep.subr.bf16.mxu0 %v3414_v15  ;;  %3032 = vmatprep.subr.bf16.mxu1 %v3329_v32 }
 0x687   :  { %3005 = vmatpush1.bf16.msra.mxu0 %v3426_v24  ;;  %3034 = vmatpush3.bf16.msra.mxu1 %v3471_v58 }
 0x688   :  { %3007 = vmatprep.subr.bf16.mxu0 %v3430_v25  ;;  %3035 = vmatprep.subr.bf16.mxu1 %v3329_v32 }
 0x68b   :  { %3009 = vmatpush1.bf16.msra.mxu0 %v3441_v31  ;;  %3037 = vmatpush3.bf16.msra.mxu1 %v3481_v2 }
 0x68c   :  { %3011 = vmatprep.subr.bf16.mxu0 %v3445_v35  ;;  %3038 = vmatprep.subr.bf16.mxu1 %v3329_v32 }
 0x68f   :  { %3013 = vmatpush1.bf16.msra.mxu0 %v3452_v41  ;;  %3040 = vmatpush3.bf16.msra.mxu1 %v3489_v7 }
 0x690   :  { %3015 = vmatprep.subr.bf16.mxu0 %v3455_v44  ;;  %3041 = vmatprep.subr.bf16.mxu1 %v3329_v32 }
 0x693   :  { %3017 = vmatpush1.bf16.msra.mxu0 %v3464_v50  ;;  %3043 = vmatpush3.bf16.msra.mxu1 %v3501_v13 }
 0x694   :  { %3019 = vmatprep.subr.bf16.mxu0 %v3468_v53  ;;  %3044 = vmatprep.subr.bf16.mxu1 %v3329_v32 }
 0x697   :  { %3021 = vmatpush1.bf16.msra.mxu0 %v3474_v59  ;;  %3046 = vmatpush3.bf16.msra.mxu1 %v3508_v18 }
 0x698   :  { %3023 = vmatprep.subr.bf16.mxu0 %v3478_v62  ;;  %3047 = vmatprep.subr.bf16.mxu1 %v3329_v32 }
 0x69b   :  { %3025 = vmatpush1.bf16.msra.mxu0 %v3484_v3  ;;  %3049 = vmatpush3.bf16.msra.mxu1 %v3514_v21 }
 0x69c   :  { %3050 = vmatprep.subr.bf16.mxu0 %v3329_v32 }
 0x751   :  { %v1616_v8 = vpop.f32.mrb[12].mxu0  ;;  %v1687_v9 = vpop.f32.mrb[18].mxu1 }
 0x752   :  { %v1692_v14 = vrot.slane %v1616_v8, 2  ;;  %v1693_v15 = vrot.slane %v1616_v8, 3  ;;  %v1618_v24 = vpop.f32.mrb[13].mxu0  ;;  %v2531_v25 = vpop.f32.mrb[19].mxu1  ;;  %v1729_v26 = vadd.f32 %v3885_v23, %v1687_v9  ;;  %v3054_v8 = vpack.c.bf16 %v1965_v48, %v1964_v10  ;;  %v1966_v9 = vld [vmem:[#allocation5 + $0x20] sm:$0xff] }
 0x753   :  { %v1711_v31 = vrot.slane %v1618_v24, 2  ;;  %v1712_v35 = vrot.slane %v1618_v24, 3  ;;  %v1968_v24 = vld [vmem:[#allocation5 + $0x30] sm:$0xff] }
 0x754   :  { %v1696_v40 = vadd.f32 %v1692_v14, %v3553_v42  ;;  %v1697_v41 = vadd.f32 %v1693_v15, %v3555_v45  ;;  %v1731_v27 = vrot.slane %v1729_v26, 2  ;;  %v1732_v17 = vrot.slane %v1729_v26, 3  ;;  %v1967_v14 = vld [vmem:[#allocation5 + $0x28] sm:$0xff] }
 0x755   :  { %v1715_v44 = vadd.f32 %v1711_v31, %v3558_v51  ;;  %v1716_v49 = vadd.f32 %v1712_v35, %v3561_v56  ;;  %v3057_v15 = vpack.c.bf16 %v1967_v14, %v1966_v9  ;;  %v1970_v31 = vld [vmem:[#allocation5 + $0x40] sm:$0xff]  ;;  %v1971_v35 = vld [vmem:[#allocation5 + $0x48] sm:$0xff] }
 0x756   :  { %v2116_v50 = vmul.f32 -1.442695, %v1696_v40  ;;  %v2117_v53 = vmul.f32 -1.442695, %v1697_v41  ;;  %v3063_v40 = vpack.c.bf16 %v1971_v35, %v1970_v31  ;;  %v1972_v41 = vld [vmem:[#allocation5 + $0x50] sm:$0xff] }
 0x757   :  { %v2118_v58 = vmul.f32 -1.442695, %v1715_v44  ;;  %v2119_v59 = vmul.f32 -1.442695, %v1716_v49  ;;  %v1973_v44 = vld [vmem:[#allocation5 + $0x58] sm:$0xff] }
 0x758   :  { %3205 = vpow2.f32 %v2116_v50  ;;  %v3066_v49 = vpack.c.bf16 %v1973_v44, %v1972_v41  ;;  %v1974_v50 = vld [vmem:[#allocation5 + $0x60] sm:$0xff] }
 0x759   :  { %3207 = vpow2.f32 %v2117_v53  ;;  %v1975_v53 = vld [vmem:[#allocation5 + $0x68] sm:$0xff] }
 0x75a   :  { %3209 = vpow2.f32 %v2118_v58  ;;  %v3069_v58 = vpack.c.bf16 %v1975_v53, %v1974_v50 }
 0x75b   :  { %3211 = vpow2.f32 %v2119_v59  ;;  %v1976_v59 = vld [vmem:[#allocation5 + $0x70] sm:$0xff] }
 0x762   :  { %v3206_v62 = vpop.eup %3205 }
 0x763   :  { %v3208_v2 = vpop.eup %3207  ;;  %v1704_v3 = vadd.f32 1.0, %v3206_v62  ;;  %v1977_v62 = vld [vmem:[#allocation5 + $0x78] sm:$0xff] }
 0x764   :  { %v3210_v7 = vpop.eup %3209  ;;  %v1705_v13 = vadd.f32 1.0, %v3208_v2  ;;  %v3072_v2 = vpack.c.bf16 %v1977_v62, %v1976_v59 }
 0x765   :  { %v3212_v18 = vpop.eup %3211  ;;  %3213 = vrcp.f32 %v1704_v3  ;;  %v1723_v21 = vadd.f32 1.0, %v3210_v7 }
 0x766   :  { %3215 = vrcp.f32 %v1705_v13  ;;  %v1724_v6 = vadd.f32 1.0, %v3212_v18 }
 0x767   :  { %3217 = vrcp.f32 %v1723_v21 }
 0x768   :  { %3219 = vrcp.f32 %v1724_v6 }
 0x76f   :  { %v3214_v12 = vpop.eup %3213 }
 0x770   :  { %v3216_v34 = vpop.eup %3215  ;;  %v1735_v38 = vmul.f32 %v3214_v12, %v1731_v27 }
 0x771   :  { %v3218_v30 = vpop.eup %3217  ;;  %v1736_v33 = vmul.f32 %v3216_v34, %v1732_v17 }
 0x772   :  { %v3220_v52 = vpop.eup %3219  ;;  %v1737_v11 = vadd.f32 %v1735_v38, %v3571_v39  ;;  %v1749_v36 = vmul.f32 %v3218_v30, %v1745_v37  ;;  %v1741_v57 = vsub.f32 1.0, %v3218_v30 }
 0x773   :  { %v1738_v54 = vadd.f32 %v1736_v33, %v3573_v47  ;;  %v1750_v55 = vmul.f32 %v3220_v52, %v1746_v60  ;;  %v1742_v22 = vsub.f32 1.0, %v3220_v52 }
 0x774   :  { %3221 = vtanh.f32 %v1737_v11 }
 0x775   :  { %3223 = vtanh.f32 %v1738_v54 }
 0x77e   :  { %v3222_v20 = vpop.eup %3221 }
 0x77f   :  { %v3224_v61 = vpop.eup %3223  ;;  %v1743_v63 = vmul.f32 %v3222_v20, %v1741_v57 }
 0x780   :  { %v1744_v19 = vmul.f32 %v3224_v61, %v1742_v22 }
 0x781   :  { %v3892_v28 = vadd.f32 %v1749_v36, %v1743_v63 }
 0x782   :  { %v3894_v29 = vadd.f32 %v1750_v55, %v1744_v19 }
 0x783   :  { %v1755_v1 = vrot.slane %v3892_v28, 6  ;;  %v1954_v61 = vrot.slane %v3892_v28, 7 }
 0x784   :  { %v1756_v5 = vrot.slane %v3894_v29, 5 }
 0x786   :  { %v1757_v43 = vsel %vm507_vm3, %v1756_v5, %v1755_v1  ;;  %v1955_v1 = vrot.slane %v3894_v29, 7 }
 0x787   :  { %1824 = vmatmul.mubr.f32.vlgmr.msra.gmra.mrb[14].mxu0 %v1757_v43  ;;  %2565 = vmatmul.mubr.f32.vlgmr.msra.gmra.mrb[20].mxu1 %v1757_v43 }
 0x788   :  { %2599 = vmatprep.mubr.msk.f32.mxu0 %vm3330_vm2, %v3328_v0  ;;  %3052 = vmatpush3.bf16.msra.mxu0 %v3051_v46  ;;  %v1969_v0 = vld [vmem:[#allocation5 + $0x38] sm:$0xff] }
 0x789   :  { %3053 = vmatprep.subr.bf16.mxu0 %v3329_v32  ;;  %v3060_v25 = vpack.c.bf16 %v1969_v0, %v1968_v24 }
 0x78c   :  { %3055 = vmatpush3.bf16.msra.mxu0 %v3054_v8 }
 0x78d   :  { %3056 = vmatprep.subr.bf16.mxu0 %v3329_v32 }
 0x790   :  { %3058 = vmatpush3.bf16.msra.mxu0 %v3057_v15 }
 0x791   :  { %3059 = vmatprep.subr.bf16.mxu0 %v3329_v32 }
 0x794   :  { %3061 = vmatpush3.bf16.msra.mxu0 %v3060_v25 }
 0x795   :  { %3062 = vmatprep.subr.bf16.mxu0 %v3329_v32 }
 0x798   :  { %3064 = vmatpush3.bf16.msra.mxu0 %v3063_v40 }
 0x799   :  { %3065 = vmatprep.subr.bf16.mxu0 %v3329_v32 }
 0x79c   :  { %3067 = vmatpush3.bf16.msra.mxu0 %v3066_v49 }
 0x79d   :  { %3068 = vmatprep.subr.bf16.mxu0 %v3329_v32 }
 0x7a0   :  { %3070 = vmatpush3.bf16.msra.mxu0 %v3069_v58 }
 0x7a1   :  { %3071 = vmatprep.subr.bf16.mxu0 %v3329_v32 }
 0x7a4   :  { %3073 = vmatpush3.bf16.msra.mxu0 %v3072_v2 }
 0x85a   :  { %v1825_v3 = vpop.f32.mrb[14].mxu0  ;;  %v1896_v7 = vpop.f32.mrb[20].mxu1 }
 0x85b   :  { %v1901_v13 = vrot.slane %v1825_v3, 1  ;;  %v1902_v18 = vrot.slane %v1825_v3, 2  ;;  %v1827_v21 = vpop.f32.mrb[15].mxu0  ;;  %v2566_v6 = vpop.f32.mrb[21].mxu1 }
 0x85c   :  { %v1920_v26 = vrot.slane %v1827_v21, 1  ;;  %v1921_v27 = vrot.slane %v1827_v21, 2 }
 0x85d   :  { %v1905_v12 = vadd.f32 %v1901_v13, %v3553_v42  ;;  %v1906_v17 = vadd.f32 %v1902_v18, %v3555_v45 }
 0x85e   :  { %v1924_v34 = vadd.f32 %v1920_v26, %v3558_v51  ;;  %v1925_v37 = vadd.f32 %v1921_v27, %v3561_v56  ;;  %v1938_v56 = vadd.f32 %v3885_v23, %v1896_v7 }
 0x85f   :  { %v2120_v38 = vmul.f32 -1.442695, %v1905_v12  ;;  %v2121_v30 = vmul.f32 -1.442695, %v1906_v17 }
 0x860   :  { %v2122_v32 = vmul.f32 -1.442695, %v1924_v34  ;;  %v2123_v60 = vmul.f32 -1.442695, %v1925_v37  ;;  %v1940_v55 = vrot.slane %v1938_v56, 1  ;;  %v1941_v20 = vrot.slane %v1938_v56, 2 }
 0x861   :  { %3225 = vpow2.f32 %v2120_v38 }
 0x862   :  { %3227 = vpow2.f32 %v2121_v30 }
 0x863   :  { %3229 = vpow2.f32 %v2122_v32 }
 0x864   :  { %3231 = vpow2.f32 %v2123_v60 }
 0x86b   :  { %v3226_v33 = vpop.eup %3225 }
 0x86c   :  { %v3228_v52 = vpop.eup %3227  ;;  %v1913_v11 = vadd.f32 1.0, %v3226_v33 }
 0x86d   :  { %v3230_v36 = vpop.eup %3229  ;;  %v1914_v54 = vadd.f32 1.0, %v3228_v52 }
 0x86e   :  { %v3232_v42 = vpop.eup %3231  ;;  %3233 = vrcp.f32 %v1913_v11  ;;  %v1932_v45 = vadd.f32 1.0, %v3230_v36 }
 0x86f   :  { %3235 = vrcp.f32 %v1914_v54  ;;  %v1933_v51 = vadd.f32 1.0, %v3232_v42 }
 0x870   :  { %3237 = vrcp.f32 %v1932_v45 }
 0x871   :  { %3239 = vrcp.f32 %v1933_v51 }
 0x878   :  { %v3234_v57 = vpop.eup %3233 }
 0x879   :  { %v3236_v22 = vpop.eup %3235  ;;  %v1944_v63 = vmul.f32 %v3234_v57, %v1940_v55 }
 0x87a   :  { %v3238_v19 = vpop.eup %3237  ;;  %v1945_v5 = vmul.f32 %v3236_v22, %v1941_v20 }
 0x87b   :  { %v3240_v43 = vpop.eup %3239  ;;  %v1946_v4 = vadd.f32 %v1944_v63, %v3571_v39  ;;  %v1958_v16 = vmul.f32 %v3238_v19, %v1954_v61  ;;  %v1950_v23 = vsub.f32 1.0, %v3238_v19  ;;  %v2124_v39 = vld [vmem:[%s3940_s7] ss:$0 sm:$0xff] }
 0x87c   :  { %v1947_v46 = vadd.f32 %v1945_v5, %v3573_v47  ;;  %v1959_v10 = vmul.f32 %v3240_v43, %v1955_v1  ;;  %v1951_v8 = vsub.f32 1.0, %v3240_v43 }
 0x87d   :  { %3241 = vtanh.f32 %v1946_v4 }
 0x87e   :  { %3243 = vtanh.f32 %v1947_v46 }
 0x887   :  { %v3242_v48 = vpop.eup %3241 }
 0x888   :  { %v3244_v9 = vpop.eup %3243  ;;  %v1952_v14 = vmul.f32 %v3242_v48, %v1950_v23 }
 0x889   :  { %v1953_v28 = vmul.f32 %v3244_v9, %v1951_v8 }
 0x88a   :  { %v1960_v15 = vadd.f32 %v1958_v16, %v1952_v14 }
 0x88b   :  { %v1961_v24 = vadd.f32 %v1959_v10, %v1953_v28 }
 0x88c   :  { %v1987_v0 = vrot.slane %v1960_v15, 7 }
 0x88d   :  { %v1988_v29 = vrot.slane %v1961_v24, 6 }
 0x88f   :  { %v1989_v25 = vsel %vm507_vm3, %v1988_v29, %v1987_v0 }
 0x890   :  { %2600 = vmatmul.mubr.f32.vlgmr.msra.gmra.mrb[16].mxu0 %v1989_v25 }
 0x963   :  { %v2057_v47 = vpop.f32.mrb[16].mxu0 }
 0x964   :  { %v2058_v31 = vadd.f32 %v2124_v39, %v2057_v47  ;;  %v2601_v35 = vpop.f32.mrb[17].mxu0 }
 0x966   :  { %v2125_v40 = vmul.f32 -1.442695, %v2058_v31 }
 0x968   :  { %3245 = vpow2.f32 %v2125_v40 }
 0x972   :  { %v3246_v41 = vpop.eup %3245 }
 0x973   :  { %v2064_v44 = vadd.f32 1.0, %v3246_v41 }
 0x975   :  { %3247 = vrcp.f32 %v2064_v44 }
 0x97f   :  { %v3248_v49 = vpop.eup %3247 }
 0x980   :  { %2067 = vst [vmem:[#allocation7] sm:$0x3] %v3248_v49 }
 0x981   :  { %3305 = shalt.err (!%p3302_p6)
}
 0x982   :  { %s3306_s26 = scalar_lea.hbm %s3941_s8, 32 }
 0x983   :  { %p3307_p7 = scmp.ne.s32.totalorder %s3941_s8, %s3306_s26  ;;  %p3310_p8 = scmp.lt.u32.totalorder %s3306_s26, %s3941_s8 }
 0x985   :  { %p3312_p9 = pnand %p3310_p8, %p3307_p7 }
 0x987   :  { %3315 = shalt.err (!%p3312_p9)
}
 0x988   :  { %2077 = dma.vmem_to_hbm [thread:$0]  %s2075_s23, 32, %s3941_s8, [#allocation4]  }
 0x989   :  { %3320 = dma.done.wait [#allocation4], 32  }
 0x98a   :  { %3321 = vsyncadd [#allocation4], 4294967264 }
 0x98b   :  { %2081 = vsyncpa [#allocation3], 1 }
 0x98c   :  { %2082 = vsyncpa [#allocation6], 1 }
 0x98d   :  { %2083 = vsyncpa [#allocation4], 1 }

</bundles_post_ra>
